<compile_context>
chip_gen: v7x
topology: tpu7x:2x2x1
jax: 0.10.0
libtpu: 0.0.40
codegen_flags: <defaults>
</compile_context>

<pallas_src>
import functools

import jax
import jax.numpy as jnp
from jax.experimental import pallas as pl
from jax.experimental.pallas import tpu as pltpu


# --------------------------------------------------------------------------
# Pallas kernel: one (batch, point-tile) per grid step.
# --------------------------------------------------------------------------
def _pwg12_kernel(H, W, H8,
                  xy_ref, img_ref, pts_ref,
                  w1i_ref, w1p_ref, b1_ref, w2_ref, b2_ref, w3_ref, b3_ref,
                  out_ref):
    dtype = w1i_ref.dtype
    xy = xy_ref[0]                      # (2, TN)       f32
    img = img_ref[0]                    # (C_I*H8, W)   matmul dtype (rows H..H8 zero-padded)
    pts = pts_ref[0]                    # (C_P, TN)     f32
    TN = xy.shape[-1]
    C_I = img.shape[0] // H8

    # ---- bilinear sampling coordinates (align_corners=False) -------------
    x = xy[0:1, :]
    y = xy[1:2, :]
    ix = (x + 1.0) * (W * 0.5) - 0.5
    iy = (y + 1.0) * (H * 0.5) - 0.5
    x0f = jnp.floor(ix)
    y0f = jnp.floor(iy)
    x0 = x0f.astype(jnp.int32)
    y0 = y0f.astype(jnp.int32)
    wx1 = ix - x0f
    wx0 = 1.0 - wx1
    wy1 = iy - y0f
    wy0 = 1.0 - wy1

    # Separable one-hots; out-of-range corner indices never match the iota
    # (zeros padding), and padded image rows are zero -> no explicit masks.
    w_iota = jax.lax.broadcasted_iota(jnp.int32, (W, TN), 0)
    cx = (jnp.where(w_iota == x0, wx0, 0.0) +
          jnp.where(w_iota == x0 + 1, wx1, 0.0))            # (W, TN)  f32
    h_iota = jax.lax.broadcasted_iota(jnp.int32, (H8, TN), 0)
    ry = (jnp.where(h_iota == y0, wy0, 0.0) +
          jnp.where(h_iota == y0 + 1, wy1, 0.0))            # (H8, TN) f32

    # Column gather on the MXU, row blend on the VPU + sublane reduce (XLU).
    # TODO(synk): replace with a true in-kernel dynamic gather along the HW axis once a
    #             Mosaic gather lowering is verified; that would cut the remaining
    #             O(C_I*H*W*TN) MXU work to O(C_I*TN).
    t = jnp.dot(img, cx.astype(dtype),
                preferred_element_type=jnp.float32)                         # (C_I*H8, TN)
    sampled = jnp.sum(t.reshape(C_I, H8, TN) * ry.reshape(1, H8, TN),
                      axis=1)                                               # (C_I, TN) f32

    # ---- spatial_att MLP: fused Conv1d+BN (folded, split) -> ReLU -> Conv -> ReLU -> Conv
    pts_mm = pts.astype(dtype)
    h1 = jnp.maximum(
        jnp.dot(w1i_ref[...], sampled.astype(dtype), preferred_element_type=jnp.float32)
        + jnp.dot(w1p_ref[...], pts_mm, preferred_element_type=jnp.float32)
        + b1_ref[...],
        0.0)                                                                # (C_T, TN)
    h2 = jnp.maximum(
        jnp.dot(w2_ref[...], h1.astype(dtype), preferred_element_type=jnp.float32)
        + b2_ref[...], 0.0)                                                 # (C_R, TN)
    att = (jnp.dot(w3_ref[...], h2.astype(dtype), preferred_element_type=jnp.float32)
           + b3_ref[...])                                                   # (C_T, TN)

    satt = jnp.tanh(jnp.max(att, axis=0, keepdims=True))                    # (1, TN) f32
    out_ref[0] = ((1.0 + satt) * pts).astype(out_ref.dtype)


# --------------------------------------------------------------------------
# Wrapper
# --------------------------------------------------------------------------
def _choose_point_tile(n_pad, max_tile=512):
    for t in (512, 384, 256, 128):
        if t <= max_tile and n_pad % t == 0:
            return t
    return 128


def pointwise_gate12(pts_img, img_feats, pts_feats, params,
                     *, matmul_dtype=jnp.bfloat16, max_points_tile=512):
    """pts_img (B,N,2), img_feats (B,C_I,H,W), pts_feats (B,C_P,N) -> (B,C_P,N)."""
    B, N, _ = pts_img.shape
    _, C_I, H, W = img_feats.shape
    C_P = pts_feats.shape[1]
    C_T = C_I + C_P
    C_R = params["w2"].shape[0]
    assert params["w1"].shape == (C_T, C_T)

    # Pad points to a multiple of 128 lanes; pad image rows to a multiple of 8 sublanes
    # (keeps the in-kernel (C_I, H8, TN) reshape layout-preserving).
    N_pad = ((N + 127) // 128) * 128
    H8 = ((H + 7) // 8) * 8
    TN = _choose_point_tile(N_pad, max_points_tile)
    NT = N_pad // TN

    xy = jnp.transpose(pts_img, (0, 2, 1)).astype(jnp.float32)        # (B, 2, N)
    xy = jnp.pad(xy, ((0, 0), (0, 0), (0, N_pad - N)))
    pts = jnp.pad(pts_feats.astype(jnp.float32),
                  ((0, 0), (0, 0), (0, N_pad - N)))                   # (B, C_P, N_pad) f32
    img = jnp.pad(img_feats.astype(jnp.float32),
                  ((0, 0), (0, 0), (0, H8 - H), (0, 0)))
    img = img.reshape(B, C_I * H8, W).astype(matmul_dtype)            # (B, C_I*H8, W)

    # Fold conv1 bias + BatchNorm1d (eval mode) into the first conv (exact), then split
    # it into the img / pts halves so the kernel never builds the concatenated fusion.
    eps = 1e-5
    a = params["bn_gamma"] / jnp.sqrt(params["bn_var"] + eps)         # (C_T,)
    w1 = a[:, None] * params["w1"]
    w1i = w1[:, :C_I].astype(matmul_dtype)                            # (C_T, C_I)
    w1p = w1[:, C_I:].astype(matmul_dtype)                            # (C_T, C_P)
    b1 = (a * (params["b1"] - params["bn_mean"])
          + params["bn_beta"]).reshape(C_T, 1).astype(jnp.float32)
    w2 = params["w2"].astype(matmul_dtype)
    b2 = params["b2"].reshape(C_R, 1).astype(jnp.float32)
    w3 = params["w3"].astype(matmul_dtype)
    b3 = params["b3"].reshape(C_T, 1).astype(jnp.float32)

    full = lambda shape: pl.BlockSpec(shape, lambda b, t: tuple(0 for _ in shape))
    kernel = functools.partial(_pwg12_kernel, H, W, H8)

    out = pl.pallas_call(
        kernel,
        out_shape=jax.ShapeDtypeStruct((B, C_P, N_pad), jnp.float32),
        grid_spec=pltpu.PrefetchScalarGridSpec(
            num_scalar_prefetch=0,
            grid=(B, NT),
            in_specs=[
                pl.BlockSpec((1, 2, TN), lambda b, t: (b, 0, t)),          # xy
                pl.BlockSpec((1, C_I * H8, W), lambda b, t: (b, 0, 0)),    # img (reused over t)
                pl.BlockSpec((1, C_P, TN), lambda b, t: (b, 0, t)),        # pts
                full((C_T, C_I)),   # w1 img half (BN-folded)
                full((C_T, C_P)),   # w1 pts half (BN-folded)
                full((C_T, 1)),     # b1 (BN-folded)
                full((C_R, C_T)),   # w2
                full((C_R, 1)),     # b2
                full((C_T, C_R)),   # w3
                full((C_T, 1)),     # b3
            ],
            out_specs=pl.BlockSpec((1, C_P, TN), lambda b, t: (b, 0, t)),
        ),
        compiler_params=pltpu.CompilerParams(
            dimension_semantics=("parallel", "parallel"),
            # Small blocks by construction; raise this (and shrink the img block)
            # if C_I*H*W grows so that the double-buffered img block nears v7x's budget.
            vmem_limit_bytes=32 * 1024 * 1024),
    )(xy, img, pts, w1i, w1p, b1, w2, b2, w3, b3)

    return out[:, :, :N]


# --------------------------------------------------------------------------
# Pure-JAX reference (gather-based grid_sample) for verification.
# --------------------------------------------------------------------------
def _ref_forward(pts_img, img_feats, pts_feats, params):
    B, N, _ = pts_img.shape
    _, C_I, H, W = img_feats.shape
    x = pts_img[..., 0]
    y = pts_img[..., 1]
    ix = (x + 1.0) * (W * 0.5) - 0.5
    iy = (y + 1.0) * (H * 0.5) - 0.5
    x0 = jnp.floor(ix)
    y0 = jnp.floor(iy)
    wx1 = ix - x0
    wx0 = 1.0 - wx1
    wy1 = iy - y0
    wy0 = 1.0 - wy1

    def gather(yi, xi, w):
        valid = (xi >= 0) & (xi < W) & (yi >= 0) & (yi < H)
        xc = jnp.clip(xi, 0, W - 1).astype(jnp.int32)
        yc = jnp.clip(yi, 0, H - 1).astype(jnp.int32)
        g = jax.vmap(lambda im, yy, xx: im[:, yy, xx])(img_feats, yc, xc)
        return g * jnp.where(valid, w, 0.0)[:, None, :]

    sampled = (gather(y0, x0, wy0 * wx0) + gather(y0, x0 + 1, wy0 * wx1) +
               gather(y0 + 1, x0, wy1 * wx0) + gather(y0 + 1, x0 + 1, wy1 * wx1))

    fusion = jnp.concatenate([sampled, pts_feats], axis=1)       # (B, C_T, N)
    eps = 1e-5
    a = params["bn_gamma"] / jnp.sqrt(params["bn_var"] + eps)
    z = jnp.einsum("oc,bcn->bon", params["w1"], fusion) + params["b1"][None, :, None]
    z = a[None, :, None] * (z - params["bn_mean"][None, :, None]) + params["bn_beta"][None, :, None]
    h1 = jax.nn.relu(z)
    h2 = jax.nn.relu(jnp.einsum("oc,bcn->bon", params["w2"], h1)
                     + params["b2"][None, :, None])
    att = jnp.einsum("oc,bcn->bon", params["w3"], h2) + params["b3"][None, :, None]
    satt = jnp.tanh(jnp.max(att, axis=1, keepdims=True))
    return (1.0 + satt) * pts_feats


# --------------------------------------------------------------------------
if __name__ == "__main__":
    B, N = 2, 1000
    C_I, C_P = 16, 32
    H, W = 12, 20
    REDUCTION = 4
    C_T = C_I + C_P
    C_R = C_T // REDUCTION

    key = jax.random.PRNGKey(0)
    ks = jax.random.split(key, 13)

    pts_img = jax.random.uniform(ks[0], (B, N, 2), jnp.float32, -1.1, 1.1)
    img_feats = jax.random.normal(ks[1], (B, C_I, H, W), jnp.float32)
    pts_feats = jax.random.normal(ks[2], (B, C_P, N), jnp.float32)

    params = {
        "w1": 0.1 * jax.random.normal(ks[3], (C_T, C_T), jnp.float32),
        "b1": 0.1 * jax.random.normal(ks[4], (C_T,), jnp.float32),
        "bn_gamma": jax.random.uniform(ks[5], (C_T,), jnp.float32, 0.5, 1.5),
        "bn_beta": 0.1 * jax.random.normal(ks[6], (C_T,), jnp.float32),
        "bn_mean": 0.1 * jax.random.normal(ks[7], (C_T,), jnp.float32),
        "bn_var": jax.random.uniform(ks[8], (C_T,), jnp.float32, 0.5, 1.5),
        "w2": 0.1 * jax.random.normal(ks[9], (C_R, C_T), jnp.float32),
        "b2": 0.1 * jax.random.normal(ks[10], (C_R,), jnp.float32),
        "w3": 0.1 * jax.random.normal(ks[11], (C_T, C_R), jnp.float32),
        "b3": 0.1 * jax.random.normal(ks[12], (C_T,), jnp.float32),
    }

    ref = jax.block_until_ready(_ref_forward(pts_img, img_feats, pts_feats, params))

    # all-f32 matmul path: tight check against the reference.
    out_f32 = jax.block_until_ready(
        pointwise_gate12(pts_img, img_feats, pts_feats, params,
                         matmul_dtype=jnp.float32))
    assert out_f32.shape == (B, C_P, N), out_f32.shape
    err32 = float(jnp.max(jnp.abs(out_f32 - ref)))
    assert jnp.allclose(out_f32, ref, atol=1e-2, rtol=1e-2), err32

    # default path (bf16 matmul operands, f32 accumulate/elementwise): looser tolerance.
    out_bf16 = jax.block_until_ready(
        pointwise_gate12(pts_img, img_feats, pts_feats, params))
    assert out_bf16.shape == (B, C_P, N), out_bf16.shape
    err16 = float(jnp.max(jnp.abs(out_bf16 - ref)))
    assert jnp.allclose(out_bf16, ref, atol=1e-1, rtol=5e-2), err16

    print("KERNEL_OK")
</pallas_src>

<mosaic_0001>
module attributes {stable_mosaic.version = 11 : i64} {
  func.func @_pwg12_kernel(%arg0: i32, %arg1: i32, %arg2: memref<1x2x512xf32, #tpu.memory_space<vmem>>, %arg3: memref<1x256x20xf32, #tpu.memory_space<vmem>>, %arg4: memref<1x32x512xf32, #tpu.memory_space<vmem>>, %arg5: memref<48x16xf32, #tpu.memory_space<vmem>>, %arg6: memref<48x32xf32, #tpu.memory_space<vmem>>, %arg7: memref<48x1xf32, #tpu.memory_space<vmem>>, %arg8: memref<12x48xf32, #tpu.memory_space<vmem>>, %arg9: memref<12x1xf32, #tpu.memory_space<vmem>>, %arg10: memref<48x12xf32, #tpu.memory_space<vmem>>, %arg11: memref<48x1xf32, #tpu.memory_space<vmem>>, %arg12: memref<1x32x512xf32, #tpu.memory_space<vmem>>) attributes {dimension_semantics = [#tpu.dimension_semantics<parallel>, #tpu.dimension_semantics<parallel>], iteration_bounds = array<i64: 2, 2>, scalar_prefetch = 0 : i64, scratch_operands = 0 : i64, tpu.core_type = #tpu.core_type<tc>, window_params = [{transform_indices = @transform_0, window_bounds = array<i64: 1, 2, 512>}, {transform_indices = @transform_1, window_bounds = array<i64: 1, 256, 20>}, {transform_indices = @transform_2, window_bounds = array<i64: 1, 32, 512>}, {pipeline_mode = #tpu.pipeline_mode<synchronous>, transform_indices = @transform_3, window_bounds = array<i64: 48, 16>}, {pipeline_mode = #tpu.pipeline_mode<synchronous>, transform_indices = @transform_4, window_bounds = array<i64: 48, 32>}, {pipeline_mode = #tpu.pipeline_mode<synchronous>, transform_indices = @transform_5, window_bounds = array<i64: 48, 1>}, {pipeline_mode = #tpu.pipeline_mode<synchronous>, transform_indices = @transform_6, window_bounds = array<i64: 12, 48>}, {pipeline_mode = #tpu.pipeline_mode<synchronous>, transform_indices = @transform_7, window_bounds = array<i64: 12, 1>}, {pipeline_mode = #tpu.pipeline_mode<synchronous>, transform_indices = @transform_8, window_bounds = array<i64: 48, 12>}, {pipeline_mode = #tpu.pipeline_mode<synchronous>, transform_indices = @transform_9, window_bounds = array<i64: 48, 1>}, {transform_indices = @transform_10, window_bounds = array<i64: 1, 32, 512>}]} {
    %c0 = arith.constant 0 : index
    %c0_0 = arith.constant 0 : index
    %c0_1 = arith.constant 0 : index
    %0 = vector.load %arg2[%c0, %c0_0, %c0_1] : memref<1x2x512xf32, #tpu.memory_space<vmem>>, vector<1x2x512xf32>
    %1 = vector.shape_cast %0 : vector<1x2x512xf32> to vector<2x512xf32>
    %c0_2 = arith.constant 0 : index
    %c0_3 = arith.constant 0 : index
    %c0_4 = arith.constant 0 : index
    %2 = vector.load %arg3[%c0_2, %c0_3, %c0_4] : memref<1x256x20xf32, #tpu.memory_space<vmem>>, vector<1x256x20xf32>
    %3 = vector.shape_cast %2 : vector<1x256x20xf32> to vector<256x20xf32>
    %c0_5 = arith.constant 0 : index
    %c0_6 = arith.constant 0 : index
    %c0_7 = arith.constant 0 : index
    %4 = vector.load %arg4[%c0_5, %c0_6, %c0_7] : memref<1x32x512xf32, #tpu.memory_space<vmem>>, vector<1x32x512xf32>
    %5 = vector.shape_cast %4 : vector<1x32x512xf32> to vector<32x512xf32>
    %6 = vector.extract_strided_slice %1 {offsets = [0, 0], sizes = [1, 512], strides = [1, 1]} : vector<2x512xf32> to vector<1x512xf32>
    %7 = vector.extract_strided_slice %1 {offsets = [1, 0], sizes = [1, 512], strides = [1, 1]} : vector<2x512xf32> to vector<1x512xf32>
    %cst = arith.constant 1.000000e+00 : f32
    %8 = vector.broadcast %cst : f32 to vector<1x512xf32>
    %9 = arith.addf %6, %8 : vector<1x512xf32>
    %cst_8 = arith.constant 1.000000e+01 : f32
    %10 = vector.broadcast %cst_8 : f32 to vector<1x512xf32>
    %11 = arith.mulf %9, %10 : vector<1x512xf32>
    %cst_9 = arith.constant 5.000000e-01 : f32
    %12 = vector.broadcast %cst_9 : f32 to vector<1x512xf32>
    %13 = arith.subf %11, %12 : vector<1x512xf32>
    %cst_10 = arith.constant 1.000000e+00 : f32
    %14 = vector.broadcast %cst_10 : f32 to vector<1x512xf32>
    %15 = arith.addf %7, %14 : vector<1x512xf32>
    %cst_11 = arith.constant 6.000000e+00 : f32
    %16 = vector.broadcast %cst_11 : f32 to vector<1x512xf32>
    %17 = arith.mulf %15, %16 : vector<1x512xf32>
    %cst_12 = arith.constant 5.000000e-01 : f32
    %18 = vector.broadcast %cst_12 : f32 to vector<1x512xf32>
    %19 = arith.subf %17, %18 : vector<1x512xf32>
    %20 = math.floor %13 : vector<1x512xf32>
    %21 = math.floor %19 : vector<1x512xf32>
    %22 = arith.fptosi %20 : vector<1x512xf32> to vector<1x512xi32>
    %23 = arith.fptosi %21 : vector<1x512xf32> to vector<1x512xi32>
    %24 = arith.subf %13, %20 : vector<1x512xf32>
    %cst_13 = arith.constant 1.000000e+00 : f32
    %25 = vector.broadcast %cst_13 : f32 to vector<1x512xf32>
    %26 = arith.subf %25, %24 : vector<1x512xf32>
    %27 = arith.subf %19, %21 : vector<1x512xf32>
    %cst_14 = arith.constant 1.000000e+00 : f32
    %28 = vector.broadcast %cst_14 : f32 to vector<1x512xf32>
    %29 = arith.subf %28, %27 : vector<1x512xf32>
    %30 = tpu.iota {dimensions = array<i32: 0>} : vector<20x512xi32>
    %31 = vector.broadcast %22 : vector<1x512xi32> to vector<20x512xi32>
    %32 = arith.cmpi eq, %30, %31 : vector<20x512xi32>
    %cst_15 = arith.constant 0.000000e+00 : f32
    %33 = vector.shape_cast %26 : vector<1x512xf32> to vector<1x512xf32>
    %34 = vector.broadcast %33 : vector<1x512xf32> to vector<20x512xf32>
    %35 = vector.broadcast %cst_15 : f32 to vector<20x512xf32>
    %36 = arith.select %32, %34, %35 : vector<20x512xi1>, vector<20x512xf32>
    %c1_i32 = arith.constant 1 : i32
    %37 = vector.broadcast %c1_i32 : i32 to vector<1x512xi32>
    %38 = arith.addi %22, %37 : vector<1x512xi32>
    %39 = vector.broadcast %38 : vector<1x512xi32> to vector<20x512xi32>
    %40 = arith.cmpi eq, %30, %39 : vector<20x512xi32>
    %cst_16 = arith.constant 0.000000e+00 : f32
    %41 = vector.shape_cast %24 : vector<1x512xf32> to vector<1x512xf32>
    %42 = vector.broadcast %41 : vector<1x512xf32> to vector<20x512xf32>
    %43 = vector.broadcast %cst_16 : f32 to vector<20x512xf32>
    %44 = arith.select %40, %42, %43 : vector<20x512xi1>, vector<20x512xf32>
    %45 = arith.addf %36, %44 : vector<20x512xf32>
    %46 = tpu.iota {dimensions = array<i32: 0>} : vector<16x512xi32>
    %47 = vector.broadcast %23 : vector<1x512xi32> to vector<16x512xi32>
    %48 = arith.cmpi eq, %46, %47 : vector<16x512xi32>
    %cst_17 = arith.constant 0.000000e+00 : f32
    %49 = vector.shape_cast %29 : vector<1x512xf32> to vector<1x512xf32>
    %50 = vector.broadcast %49 : vector<1x512xf32> to vector<16x512xf32>
    %51 = vector.broadcast %cst_17 : f32 to vector<16x512xf32>
    %52 = arith.select %48, %50, %51 : vector<16x512xi1>, vector<16x512xf32>
    %c1_i32_18 = arith.constant 1 : i32
    %53 = vector.broadcast %c1_i32_18 : i32 to vector<1x512xi32>
    %54 = arith.addi %23, %53 : vector<1x512xi32>
    %55 = vector.broadcast %54 : vector<1x512xi32> to vector<16x512xi32>
    %56 = arith.cmpi eq, %46, %55 : vector<16x512xi32>
    %cst_19 = arith.constant 0.000000e+00 : f32
    %57 = vector.shape_cast %27 : vector<1x512xf32> to vector<1x512xf32>
    %58 = vector.broadcast %57 : vector<1x512xf32> to vector<16x512xf32>
    %59 = vector.broadcast %cst_19 : f32 to vector<16x512xf32>
    %60 = arith.select %56, %58, %59 : vector<16x512xi1>, vector<16x512xf32>
    %61 = arith.addf %52, %60 : vector<16x512xf32>
    %cst_20 = arith.constant dense<0.000000e+00> : vector<256x512xf32>
    %62 = tpu.matmul %3, %45, %cst_20 {dimension_numbers = #tpu.dot_dimension_numbers<[1], [0], [0], [1], [0, 0, 1, 1], [], []>} : vector<256x20xf32>, vector<20x512xf32>, vector<256x512xf32> -> vector<256x512xf32>
    %63 = vector.shape_cast %62 : vector<256x512xf32> to vector<16x16x512xf32>
    %64 = vector.shape_cast %61 : vector<16x512xf32> to vector<1x16x512xf32>
    %65 = vector.broadcast %64 : vector<1x16x512xf32> to vector<16x16x512xf32>
    %66 = arith.mulf %63, %65 : vector<16x16x512xf32>
    %cst_21 = arith.constant dense<0.000000e+00> : vector<16x512xf32>
    %67 = vector.multi_reduction <add>, %66, %cst_21 [1] : vector<16x16x512xf32> to vector<16x512xf32>
    %c0_22 = arith.constant 0 : index
    %c0_23 = arith.constant 0 : index
    %68 = vector.load %arg5[%c0_22, %c0_23] : memref<48x16xf32, #tpu.memory_space<vmem>>, vector<48x16xf32>
    %cst_24 = arith.constant dense<0.000000e+00> : vector<48x512xf32>
    %69 = tpu.matmul %68, %67, %cst_24 {dimension_numbers = #tpu.dot_dimension_numbers<[1], [0], [0], [1], [0, 0, 1, 1], [], []>} : vector<48x16xf32>, vector<16x512xf32>, vector<48x512xf32> -> vector<48x512xf32>
    %c0_25 = arith.constant 0 : index
    %c0_26 = arith.constant 0 : index
    %70 = vector.load %arg6[%c0_25, %c0_26] : memref<48x32xf32, #tpu.memory_space<vmem>>, vector<48x32xf32>
    %cst_27 = arith.constant dense<0.000000e+00> : vector<48x512xf32>
    %71 = tpu.matmul %70, %5, %cst_27 {dimension_numbers = #tpu.dot_dimension_numbers<[1], [0], [0], [1], [0, 0, 1, 1], [], []>} : vector<48x32xf32>, vector<32x512xf32>, vector<48x512xf32> -> vector<48x512xf32>
    %72 = arith.addf %69, %71 : vector<48x512xf32>
    %c0_28 = arith.constant 0 : index
    %c0_29 = arith.constant 0 : index
    %73 = vector.load %arg7[%c0_28, %c0_29] : memref<48x1xf32, #tpu.memory_space<vmem>>, vector<48x1xf32>
    %74 = vector.broadcast %73 : vector<48x1xf32> to vector<48x512xf32>
    %75 = arith.addf %72, %74 : vector<48x512xf32>
    %cst_30 = arith.constant 0.000000e+00 : f32
    %76 = vector.broadcast %cst_30 : f32 to vector<48x512xf32>
    %77 = arith.maximumf %75, %76 : vector<48x512xf32>
    %c0_31 = arith.constant 0 : index
    %c0_32 = arith.constant 0 : index
    %78 = vector.load %arg8[%c0_31, %c0_32] : memref<12x48xf32, #tpu.memory_space<vmem>>, vector<12x48xf32>
    %cst_33 = arith.constant dense<0.000000e+00> : vector<12x512xf32>
    %79 = tpu.matmul %78, %77, %cst_33 {dimension_numbers = #tpu.dot_dimension_numbers<[1], [0], [0], [1], [0, 0, 1, 1], [], []>} : vector<12x48xf32>, vector<48x512xf32>, vector<12x512xf32> -> vector<12x512xf32>
    %c0_34 = arith.constant 0 : index
    %c0_35 = arith.constant 0 : index
    %80 = vector.load %arg9[%c0_34, %c0_35] : memref<12x1xf32, #tpu.memory_space<vmem>>, vector<12x1xf32>
    %81 = vector.broadcast %80 : vector<12x1xf32> to vector<12x512xf32>
    %82 = arith.addf %79, %81 : vector<12x512xf32>
    %cst_36 = arith.constant 0.000000e+00 : f32
    %83 = vector.broadcast %cst_36 : f32 to vector<12x512xf32>
    %84 = arith.maximumf %82, %83 : vector<12x512xf32>
    %c0_37 = arith.constant 0 : index
    %c0_38 = arith.constant 0 : index
    %85 = vector.load %arg10[%c0_37, %c0_38] : memref<48x12xf32, #tpu.memory_space<vmem>>, vector<48x12xf32>
    %cst_39 = arith.constant dense<0.000000e+00> : vector<48x512xf32>
    %86 = tpu.matmul %85, %84, %cst_39 {dimension_numbers = #tpu.dot_dimension_numbers<[1], [0], [0], [1], [0, 0, 1, 1], [], []>} : vector<48x12xf32>, vector<12x512xf32>, vector<48x512xf32> -> vector<48x512xf32>
    %c0_40 = arith.constant 0 : index
    %c0_41 = arith.constant 0 : index
    %87 = vector.load %arg11[%c0_40, %c0_41] : memref<48x1xf32, #tpu.memory_space<vmem>>, vector<48x1xf32>
    %88 = vector.broadcast %87 : vector<48x1xf32> to vector<48x512xf32>
    %89 = arith.addf %86, %88 : vector<48x512xf32>
    %cst_42 = arith.constant dense<0xFF800000> : vector<512xf32>
    %90 = vector.multi_reduction <maximumf>, %89, %cst_42 [0] : vector<48x512xf32> to vector<512xf32>
    %91 = vector.shape_cast %90 : vector<512xf32> to vector<1x512xf32>
    %92 = math.tanh %91 : vector<1x512xf32>
    %cst_43 = arith.constant 1.000000e+00 : f32
    %93 = vector.broadcast %cst_43 : f32 to vector<1x512xf32>
    %94 = arith.addf %93, %92 : vector<1x512xf32>
    %95 = vector.broadcast %94 : vector<1x512xf32> to vector<32x512xf32>
    %96 = arith.mulf %95, %5 : vector<32x512xf32>
    %c0_44 = arith.constant 0 : index
    %c0_45 = arith.constant 0 : index
    %c0_46 = arith.constant 0 : index
    %97 = vector.load %arg12[%c0_44, %c0_45, %c0_46] : memref<1x32x512xf32, #tpu.memory_space<vmem>>, vector<1x32x512xf32>
    %98 = vector.shape_cast %97 : vector<1x32x512xf32> to vector<32x512xf32>
    %99 = vector.shape_cast %96 : vector<32x512xf32> to vector<1x32x512xf32>
    tpu.vector_store %arg12[%c0_44, %c0_45, %c0_46], %99 {strides = array<i32>} : memref<1x32x512xf32, #tpu.memory_space<vmem>>, vector<1x32x512xf32>,
    return
  }
  func.func @transform_0(%arg0: i32, %arg1: i32) -> (i32, i32, i32) {
    %c0_i32 = arith.constant 0 : i32
    %c0_i32_0 = arith.constant 0 : i32
    return %arg0, %c0_i32, %arg1 : i32, i32, i32
  }
  func.func @transform_1(%arg0: i32, %arg1: i32) -> (i32, i32, i32) {
    %c0_i32 = arith.constant 0 : i32
    %c0_i32_0 = arith.constant 0 : i32
    %c0_i32_1 = arith.constant 0 : i32
    return %arg0, %c0_i32, %c0_i32_0 : i32, i32, i32
  }
  func.func @transform_2(%arg0: i32, %arg1: i32) -> (i32, i32, i32) {
    %c0_i32 = arith.constant 0 : i32
    %c0_i32_0 = arith.constant 0 : i32
    return %arg0, %c0_i32, %arg1 : i32, i32, i32
  }
  func.func @transform_3(%arg0: i32, %arg1: i32) -> (i32, i32) {
    %c0_i32 = arith.constant 0 : i32
    %c0_i32_0 = arith.constant 0 : i32
    %c0_i32_1 = arith.constant 0 : i32
    return %c0_i32, %c0_i32_0 : i32, i32
  }
  func.func @transform_4(%arg0: i32, %arg1: i32) -> (i32, i32) {
    %c0_i32 = arith.constant 0 : i32
    %c0_i32_0 = arith.constant 0 : i32
    %c0_i32_1 = arith.constant 0 : i32
    return %c0_i32, %c0_i32_0 : i32, i32
  }
  func.func @transform_5(%arg0: i32, %arg1: i32) -> (i32, i32) {
    %c0_i32 = arith.constant 0 : i32
    %c0_i32_0 = arith.constant 0 : i32
    %c0_i32_1 = arith.constant 0 : i32
    return %c0_i32, %c0_i32_0 : i32, i32
  }
  func.func @transform_6(%arg0: i32, %arg1: i32) -> (i32, i32) {
    %c0_i32 = arith.constant 0 : i32
    %c0_i32_0 = arith.constant 0 : i32
    %c0_i32_1 = arith.constant 0 : i32
    return %c0_i32, %c0_i32_0 : i32, i32
  }
  func.func @transform_7(%arg0: i32, %arg1: i32) -> (i32, i32) {
    %c0_i32 = arith.constant 0 : i32
    %c0_i32_0 = arith.constant 0 : i32
    %c0_i32_1 = arith.constant 0 : i32
    return %c0_i32, %c0_i32_0 : i32, i32
  }
  func.func @transform_8(%arg0: i32, %arg1: i32) -> (i32, i32) {
    %c0_i32 = arith.constant 0 : i32
    %c0_i32_0 = arith.constant 0 : i32
    %c0_i32_1 = arith.constant 0 : i32
    return %c0_i32, %c0_i32_0 : i32, i32
  }
  func.func @transform_9(%arg0: i32, %arg1: i32) -> (i32, i32) {
    %c0_i32 = arith.constant 0 : i32
    %c0_i32_0 = arith.constant 0 : i32
    %c0_i32_1 = arith.constant 0 : i32
    return %c0_i32, %c0_i32_0 : i32, i32
  }
  func.func @transform_10(%arg0: i32, %arg1: i32) -> (i32, i32, i32) {
    %c0_i32 = arith.constant 0 : i32
    %c0_i32_0 = arith.constant 0 : i32
    return %arg0, %c0_i32, %arg1 : i32, i32, i32
  }
}

</mosaic_0001>

<bundles_post_ra>
// kernel: tpu_custom_call.1
= control target key start
LH: loop header
LB: loop body
LE: loop exit
PB: predicated region body
PF: predicated region fallthrough
CT: control target
= control target key end

     0   :  { %15 = vsyncpa [#allocation4], 0  ;;  %s5205_s0 = inlined_call_operand.vmem [shape: f32[2,2,1024], index: 0, kind: input, shape index: {}]   ;;  %s5206_s1 = inlined_call_operand.vmem [shape: f32[2,256,20], index: 1, kind: input, shape index: {}]   ;;  %s5207_s2 = inlined_call_operand.vmem [shape: f32[2,32,1024], index: 2, kind: input, shape index: {}]   ;;  %s5208_s3 = inlined_call_operand.vmem [shape: f32[48,16], index: 3, kind: input, shape index: {}]   ;;  %s5209_s4 = inlined_call_operand.vmem [shape: f32[48,32], index: 4, kind: input, shape index: {}]   ;;  %s5210_s5 = inlined_call_operand.vmem [shape: f32[48,1], index: 5, kind: input, shape index: {}]   ;;  %s5211_s6 = inlined_call_operand.vmem [shape: f32[12,48], index: 6, kind: input, shape index: {}]   ;;  %s5212_s7 = inlined_call_operand.vmem [shape: f32[12,1], index: 7, kind: input, shape index: {}]   ;;  %s5213_s8 = inlined_call_operand.vmem [shape: f32[48,12], index: 8, kind: input, shape index: {}]   ;;  %s5214_s9 = inlined_call_operand.vmem [shape: f32[48,1], index: 9, kind: input, shape index: {}]   ;;  %s5215_s10 = inlined_call_operand.hbm [shape: f32[2,32,1024], index: 10, kind: output, shape index: {}]  }
   0x1   :  { %17 = vsyncpa [#allocation4 + $0x1], 0  ;;  %s3968_s13 = smov 0   ;;  %s3970_s14 = smov 0  }
   0x2   :  { %s3972_s15 = smov 0   ;;  %s3974_s16 = smov 0  }
   0x3   :  { %s3976_s17 = smov 0   ;;  %s3978_s18 = smov 0  }
   0x4   :  { %s3980_s19 = smov 0   ;;  %s3982_s20 = smov 0  }
   0x5 LB: > { %5222 = sst [smem:[#allocation6_spill]] %s3876_s13  ;;  %s3474_s21 = sadd.s32 4294967295, %s3904_s20   ;;  %s3904_s20 = sphi %s3982_s20, %s23_s20   ;;  %s3900_s19 = sphi %s3980_s19, %s5270_s19   ;;  %s3896_s18 = sphi %s3978_s18, %s5269_s18   ;;  %s3892_s17 = sphi %s3976_s17, %s5268_s17   ;;  %s3888_s16 = sphi %s3974_s16, %s5267_s16   ;;  %s3884_s15 = sphi %s3972_s15, %s5266_s15   ;;  %s3880_s14 = sphi %s3970_s14, %s5265_s14   ;;  %s3876_s13 = sphi %s3968_s13, %s5264_s13  }
   0x6   : > { %s3475_s22 = sadd.s32 4294967294, %s3904_s20   ;;  %s32_s23 = sadd.s32 1, %s3896_s18 }
   0x7   : > { %p33_p0 = scmp.ge.s32.totalorder %s32_s23, 2  ;;  %s35_s24 = sadd.s32 1, %s3900_s19 }
   0x8   : > { %p105_p1 = scmp.ne.s32.totalorder %s3884_s15, %s3880_s14  ;;  %p106_p2 = scmp.eq.s32.totalorder %s3904_s20, 0 }
   0x9   : > { %s5272_s23 = smov (%p33_p0, %s32_s23), 0  ;;  %s5274_s24 = smov (!%p33_p0, %s35_s24), %s3900_s19 }
   0xa   : > { %5223 = sst [smem:[#allocation7_spill]] %s5272_s23  ;;  %s94_s25 = ssub.s32 %s3896_s18, %s5272_s23 }
   0xb   : > { %p4020_p3 = por %p106_p2, %p105_p1  ;;  %p37_p4 = scmp.ge.s32.totalorder %s5274_s24, 2 }
   0xc   : > { %p284_p5 = scmp.eq.s32.totalorder %s3474_s21, 3  ;;  %p289_p6 = scmp.ne.s32.totalorder %s3880_s14, %s3876_s13 }
   0xd   : > { %p290_p7 = scmp.eq.s32.totalorder %s3475_s22, 3  ;;  %s5276_s24 = smov (%p37_p4, %s5274_s24), 0 }
   0xe   : > { %5225 = sst [smem:[#allocation8_spill]] %s5276_s24  ;;  %p4028_p8 = por %p284_p5, %p105_p1 }
   0xf   : > { %p4032_p9 = por %p290_p7, %p289_p6  ;;  %s93_s29 = ssub.s32 %s3900_s19, %s5276_s24 }
  0x10   : > { %s95_s30 = sor.u32 %s94_s25, %s93_s29  ;;  %s98_s11 = sadd.s32 1, %s3884_s15 }
  0x11   : > { %s5227_s28 = scalar_select %p4032_p9, 1, 0 }
  0x12   : > { %p96_p10 = scmp.eq.s32.totalorder %s95_s30, 0  ;;  %p3477_p11 = scmp.ge.s32.totalorder %s3904_s20, 4 }
  0x13   : > { %5228 = sst [smem:[#allocation9_spill]] %s5227_s28 }
  0x14   : > { %s4040_s12 = scalar_select %p96_p10, %s3884_s15, %s98_s11  }
  0x15   : > { %327 = sbr.rel (%p3477_p11) target bundleno = 43 (0x2b), region = 44 }
  0x1c   : > { %351 = sbr.rel (!%p4020_p3) target bundleno = 43 (0x2b), region = 56  ;;  %s353_s21 = sand.u32 (%p4020_p3), 1, %s3884_s15  }
  0x1d   : > { %s3479_s22 = sshll.u32 (%p4020_p3), %s3896_s18, 2  ;;  %s3478_s23 = sshll.u32 (%p4020_p3), %s353_s21, 7 }
  0x1e   : > { %s3480_s13 = sshll.u32 (%p4020_p3), %s3900_s19, 5  ;;  %s355_s26 = scalar_lea.vmem (%p4020_p3), [#allocation2], %s3478_s23 }
  0x1f   : > { %s358_s28 = sadd.s32 (%p4020_p3), %s3480_s13, %s3479_s22 }
  0x20   : > { %s3481_s24 = sshll.u32 (%p4020_p3), %s358_s28, 3 }
  0x21   : > { %s4051_s30 = scalar_lea.vmem (%p4020_p3), %s5207_s2, %s3481_s24 }
  0x22   : > { %v373_v0 = vld [vmem:[%s4051_s30] sm:$0xff] (%p4020_p3)  ;;  %v375_v1 = vld [vmem:[%s4051_s30 + $0x8] sm:$0xff] (%p4020_p3)  ;;  %v377_v2 = vld [vmem:[%s4051_s30 + $0x10] sm:$0xff] (%p4020_p3) }
  0x23   : > { %374 = vst [vmem:[%s355_s26] sm:$0xff] %v373_v0  ;;  %376 = vst [vmem:[%s355_s26 + $0x8] sm:$0xff] %v375_v1  ;;  %v379_v3 = vld [vmem:[%s4051_s30 + $0x18] sm:$0xff]  ;;  %v381_v4 = vld [vmem:[%s4051_s30 + $0x40] sm:$0xff] }
  0x24   : > { %378 = vst [vmem:[%s355_s26 + $0x10] sm:$0xff] %v377_v2  ;;  %v383_v5 = vld [vmem:[%s4051_s30 + $0x48] sm:$0xff]  ;;  %380 = vst [vmem:[%s355_s26 + $0x18] sm:$0xff] %v379_v3  ;;  %v385_v6 = vld [vmem:[%s4051_s30 + $0x50] sm:$0xff] }
  0x25   : > { %382 = vst [vmem:[%s355_s26 + $0x20] sm:$0xff] %v381_v4  ;;  %384 = vst [vmem:[%s355_s26 + $0x28] sm:$0xff] %v383_v5  ;;  %v387_v7 = vld [vmem:[%s4051_s30 + $0x58] sm:$0xff]  ;;  %v389_v8 = vld [vmem:[%s4051_s30 + $0x80] sm:$0xff] }
  0x26   : > { %386 = vst [vmem:[%s355_s26 + $0x30] sm:$0xff] %v385_v6  ;;  %388 = vst [vmem:[%s355_s26 + $0x38] sm:$0xff] %v387_v7  ;;  %v391_v9 = vld [vmem:[%s4051_s30 + $0x88] sm:$0xff]  ;;  %v393_v10 = vld [vmem:[%s4051_s30 + $0x90] sm:$0xff] }
  0x27   : > { %390 = vst [vmem:[%s355_s26 + $0x40] sm:$0xff] %v389_v8  ;;  %v395_v11 = vld [vmem:[%s4051_s30 + $0x98] sm:$0xff]  ;;  %392 = vst [vmem:[%s355_s26 + $0x48] sm:$0xff] %v391_v9  ;;  %v397_v12 = vld [vmem:[%s4051_s30 + $0xc0] sm:$0xff] }
  0x28   : > { %394 = vst [vmem:[%s355_s26 + $0x50] sm:$0xff] %v393_v10  ;;  %396 = vst [vmem:[%s355_s26 + $0x58] sm:$0xff] %v395_v11  ;;  %v399_v13 = vld [vmem:[%s4051_s30 + $0xc8] sm:$0xff]  ;;  %v401_v14 = vld [vmem:[%s4051_s30 + $0xd0] sm:$0xff] }
  0x29   : > { %398 = vst [vmem:[%s355_s26 + $0x60] sm:$0xff] %v397_v12  ;;  %400 = vst [vmem:[%s355_s26 + $0x68] sm:$0xff] %v399_v13  ;;  %v403_v15 = vld [vmem:[%s4051_s30 + $0xd8] sm:$0xff] }
  0x2a   : > { %402 = vst [vmem:[%s355_s26 + $0x70] sm:$0xff] %v401_v14  ;;  %404 = vst [vmem:[%s355_s26 + $0x78] sm:$0xff] %v403_v15 }
  0x2b PF: > { %p3482_p12 = scmp.ge.s32.totalorder %s3904_s20, 1  ;;  %p409_p13 = scmp.lt.s32.totalorder %s3904_s20, 5 }
  0x2d   : > { %p410_p0 = pnand %p3482_p12, %p409_p13 }
  0x2f   : > { %413 = sbr.rel (%p410_p0) target bundleno = 1245 (0x4dd), region = 79 }
  0x36   : > { %s4072_s13 = sshll.u32 %s3888_s16, 2  ;;  %p468_p1 = scmp.lt.s32.totalorder %s3892_s17, 1  ;;  %v5220_v16 = vmov 0.0   ;;  %v546_v17 = vlaneseq  ;;  %vm1025_vm10 = vcmask 1043456  }
  0x37   : > { %p470_p2 = scmp.lt.s32.totalorder %s4072_s13, 7  ;;  %1102 = vmatprep.mubr.f32.mxu0 %v5220_v16  ;;  %1359 = vmatprep.mubr.f32.mxu1 %v5220_v16 }
  0x38   : > { %s4079_s23 = scalar_select %p468_p1, %s3892_s17, 1  ;;  %v4089_v21 = vshrl.u32 %v546_v17, 7 }
  0x39   : > { %s471_s24 = scalar_select %p470_p2, %s4072_s13, 7 }
  0x3a   : > { %s3486_s28 = sshll.u32 %s4079_s23, 3  ;;  %v556_v24 = vsub.s32 2, %v4089_v21  ;;  %v4093_v25 = vsub.s32 0, %v4089_v21  ;;  %v564_v26 = vsub.s32 6, %v4089_v21  ;;  %v4097_v27 = vsub.s32 4, %v4089_v21  ;;  %s3610_s29 = sshll.u32 %s4079_s23, 8 }
  0x3b   : > { %s473_s11 = sadd.s32 %s3486_s28, %s471_s24  ;;  %v4107_v32 = vadd.s32 8, %v4089_v21  ;;  %v4116_v37 = vadd.s32 16, %v4089_v21  ;;  %s4198_s23 = scalar_lea.vmem %s5206_s1, %s3610_s29 }
  0x3c   : > { %s3487_s21 = sshll.u32 %s473_s11, 1  ;;  %s416_s24 = sand.u32 1, %s3880_s14  }
  0x3d   : > { %s475_s16 = scalar_lea.vmem %s5205_s0, %s3487_s21  ;;  %s4365_s28 = sshll.u32 %s416_s24, 7 }
  0x3e   : > { %v484_v18 = vld [vmem:[%s475_s16] sm:$0xff]  ;;  %s4369_s11 = scalar_lea.vmem [#allocation2], %s4365_s28  ;;  %s3606_s29 = sshll.u32 %s3892_s17, 5 }
  0x3f   : > { %v4086_v19 = vadd.f32 1.0, %v484_v18  ;;  %s5105_s30 = sadd.s32 %s3606_s29, %s4072_s13  ;;  %s5117_s17 = scalar_lea.vmem [#allocation3], %s4365_s28 }
  0x40   : > { %s3607_s26 = sshll.u32 %s5105_s30, 7  ;;  %s3359_s13 = sshll.u32 %s5117_s17, 4  ;;  %s5137_s13 = int_to_ptr.vmem [resolvable:$true] %s3359_s13 }
  0x41   : > { %v534_v20 = vmul.f32 10.0, %v4086_v19  ;;  %s5127_s21 = scalar_lea.hbm %s5215_s10, %s3607_s26  ;;  %s5153_s22 = scalar_lea.sflag [#allocation4], %s416_s24 }
  0x42   : > { %s3810_s25 = scalar_lea.vmem %s5137_s13, 2048  ;;  %s3909_s16 = smov [#allocation3]  }
  0x43   : > { %v3490_v22 = vadd.f32 -0.5, %v534_v20  ;;  %p3811_p3 = scmp.ne.s32.totalorder %s5137_s13, %s3810_s25 }
  0x45   : > { %v538_v23 = vfloor.f32 %v3490_v22  ;;  %p3812_p4 = pnand %p3811_p3, %p4028_p8 }
  0x47   : > { %v3703_v28 = vtrunc.f32 %v538_v23  ;;  %v4099_v29 = vsub.f32 %v3490_v22, %v538_v23  ;;  %p3813_p5 = pneg %p3812_p4 }
  0x49   : > { %v4101_v30 = vcvt.f32.s32 %v3703_v28  ;;  %v4104_v31 = vsub.f32 1.0, %v4099_v29  ;;  %v696_v33 = vrot.slane %v4099_v29, %v556_v24  ;;  %v704_v34 = vrot.slane %v4099_v29, %v564_v26 }
  0x4a   : > { %v692_v35 = vrot.slane %v4099_v29, %v4093_v25  ;;  %v700_v36 = vrot.slane %v4099_v29, %v4097_v27 }
  0x4b   : > { %v557_v38 = vrot.slane %v4101_v30, %v556_v24  ;;  %v602_v39 = vrot.slane %v4104_v31, %v556_v24  ;;  %v643_v40 = vadd.s32 1, %v4101_v30  ;;  %v4122_v41 = vrot.slane %v696_v33, %v4093_v25 }
  0x4c   : > { %v565_v42 = vrot.slane %v4101_v30, %v564_v26  ;;  %v610_v43 = vrot.slane %v4104_v31, %v564_v26  ;;  %v4127_v44 = vrot.slane %v704_v34, %v4093_v25  ;;  %v553_v45 = vrot.slane %v4101_v30, %v4093_v25 }
  0x4d   : > { %v573_v46 = vrot.slane %v557_v38, %v4093_v25  ;;  %v622_v47 = vrot.slane %v602_v39, %v4093_v25  ;;  %v651_v48 = vrot.slane %v643_v40, %v556_v24  ;;  %v659_v49 = vrot.slane %v643_v40, %v564_v26 }
  0x4e   : > { %v4134_v50 = vrot.slane %v565_v42, %v4093_v25  ;;  %v4137_v51 = vrot.slane %v610_v43, %v4093_v25  ;;  %v4140_v52 = vrot.slane %v553_v45, %v4093_v25  ;;  %v598_v53 = vrot.slane %v4104_v31, %v4093_v25 }
  0x4f   : > { %vm583_vm0 = vcmp.eq.s32.totalorder %v4089_v21, %v573_v46  ;;  %vm587_vm1 = vcmp.eq.s32.totalorder %v4107_v32, %v573_v46  ;;  %v667_v54 = vrot.slane %v651_v48, %v4093_v25  ;;  %v4148_v55 = vrot.slane %v659_v49, %v4093_v25  ;;  %v486_v49 = vld [vmem:[%s4198_s23 + $0x8] sm:$0xff] }
  0x50   : > { %v632_v56 = vsel %vm583_vm0, %v622_v47, 0.0  ;;  %v636_v57 = vsel %vm587_vm1, %v622_v47, 0.0  ;;  %vm585_vm2 = vcmp.eq.s32.totalorder %v4089_v21, %v4134_v50  ;;  %vm589_vm3 = vcmp.eq.s32.totalorder %v4107_v32, %v4134_v50 }
  0x51   : > { %vm677_vm4 = vcmp.eq.s32.totalorder %v4089_v21, %v667_v54  ;;  %vm681_vm5 = vcmp.eq.s32.totalorder %v4107_v32, %v667_v54  ;;  %v634_v58 = vsel %vm585_vm2, %v4137_v51, 0.0  ;;  %v638_v59 = vsel %vm589_vm3, %v4137_v51, 0.0 }
  0x52   : > { %v726_v60 = vsel %vm677_vm4, %v4122_v41, 0.0  ;;  %v730_v61 = vsel %vm681_vm5, %v4122_v41, 0.0  ;;  %vm679_vm6 = vcmp.eq.s32.totalorder %v4089_v21, %v4148_v55  ;;  %vm683_vm7 = vcmp.eq.s32.totalorder %v4107_v32, %v4148_v55 }
  0x53   : > { %v738_v62 = vadd.f32 %v726_v60, %v632_v56  ;;  %v742_v63 = vadd.f32 %v730_v61, %v636_v57  ;;  %v728_v0 = vsel %vm679_vm6, %v4127_v44, 0.0  ;;  %v732_v1 = vsel %vm683_vm7, %v4127_v44, 0.0  ;;  %v494_v56 = vld [vmem:[%s4198_s23 + $0x48] sm:$0xff]  ;;  %v495_v57 = vld [vmem:[%s4198_s23 + $0x50] sm:$0xff] }
  0x54   : > { %v740_v2 = vadd.f32 %v728_v0, %v634_v58  ;;  %v744_v3 = vadd.f32 %v732_v1, %v638_v59  ;;  %vm582_vm8 = vcmp.eq.s32.totalorder %v4089_v21, %v4140_v52  ;;  %vm586_vm9 = vcmp.eq.s32.totalorder %v4107_v32, %v4140_v52  ;;  %v496_v58 = vld [vmem:[%s4198_s23 + $0x58] sm:$0xff]  ;;  %v497_v59 = vld [vmem:[%s4198_s23 + $0x60] sm:$0xff]  ;;  %v498_v60 = vld [vmem:[%s4198_s23 + $0x68] sm:$0xff] }
  0x55   : > { %v3611_v4 = vpack.c.bf16 %v742_v63, %v738_v62  ;;  %v618_v5 = vrot.slane %v598_v53, %v4093_v25  ;;  %v647_v6 = vrot.slane %v643_v40, %v4093_v25  ;;  %v712_v7 = vrot.slane %v692_v35, %v4093_v25  ;;  %v491_v53 = vld [vmem:[%s4198_s23 + $0x30] sm:$0xff]  ;;  %v500_v62 = vld [vmem:[%s4198_s23 + $0x78] sm:$0xff]  ;;  %v501_v63 = vld [vmem:[%s4198_s23 + $0x80] sm:$0xff] }
  0x56   : > { %v3615_v8 = vpack.c.bf16 %v744_v3, %v740_v2  ;;  %v561_v9 = vrot.slane %v4101_v30, %v4097_v27  ;;  %v606_v10 = vrot.slane %v4104_v31, %v4097_v27  ;;  %v655_v11 = vrot.slane %v643_v40, %v4097_v27  ;;  %v499_v61 = vld [vmem:[%s4198_s23 + $0x70] sm:$0xff]  ;;  %v502_v0 = vld [vmem:[%s4198_s23 + $0x88] sm:$0xff]  ;;  %v504_v2 = vld [vmem:[%s4198_s23 + $0x98] sm:$0xff] }
  0x57   : > { %3612 = vmatprep.subr.bf16.mxu0 %v3611_v4  ;;  %v631_v12 = vsel %vm582_vm8, %v618_v5, 0.0  ;;  %v635_v13 = vsel %vm586_vm9, %v618_v5, 0.0  ;;  %v663_v14 = vrot.slane %v647_v6, %v4093_v25  ;;  %v720_v15 = vrot.slane %v700_v36, %v4093_v25  ;;  %v503_v1 = vld [vmem:[%s4198_s23 + $0x90] sm:$0xff]  ;;  %v505_v3 = vld [vmem:[%s4198_s23 + $0xa0] sm:$0xff]  ;;  %v506_v4 = vld [vmem:[%s4198_s23 + $0xa8] sm:$0xff] }
  0x58   : > { %3616 = vmatprep.subr.bf16.mxu1 %v3615_v8  ;;  %v577_v17 = vrot.slane %v561_v9, %v4093_v25  ;;  %v626_v18 = vrot.slane %v606_v10, %v4093_v25  ;;  %v671_v20 = vrot.slane %v655_v11, %v4093_v25  ;;  %vm591_vm11 = vcmp.eq.s32.totalorder %v4116_v37, %v573_v46  ;;  %v508_v6 = vld [vmem:[%s4198_s23 + $0xb8] sm:$0xff]  ;;  %v510_v8 = vld [vmem:[%s4198_s23 + $0xc8] sm:$0xff]  ;;  %v511_v9 = vld [vmem:[%s4198_s23 + $0xd0] sm:$0xff] }
  0x59   : > { %vm676_vm12 = vcmp.eq.s32.totalorder %v4089_v21, %v663_v14  ;;  %vm680_vm13 = vcmp.eq.s32.totalorder %v4107_v32, %v663_v14  ;;  %v640_v22 = vsel %vm591_vm11, %v622_v47, 0.0  ;;  %vm685_vm14 = vcmp.eq.s32.totalorder %v4116_v37, %v667_v54  ;;  %v492_v54 = vld [vmem:[%s4198_s23 + $0x38] sm:$0xff]  ;;  %v513_v11 = vld [vmem:[%s4198_s23 + $0xe0] sm:$0xff] }
  0x5a   : > { %v725_v23 = vsel %vm676_vm12, %v712_v7, 0.0  ;;  %v729_v24 = vsel %vm680_vm13, %v712_v7, 0.0  ;;  %vm584_vm15 = vcmp.eq.s32.totalorder %v4089_v21, %v577_v17  ;;  %vm588_vm0 = vcmp.eq.s32.totalorder %v4107_v32, %v577_v17  ;;  %v512_v10 = vld [vmem:[%s4198_s23 + $0xd8] sm:$0xff] }
  0x5b   : > { %v737_v26 = vadd.f32 %v725_v23, %v631_v12  ;;  %v741_v27 = vadd.f32 %v729_v24, %v635_v13  ;;  %v633_v28 = vsel %vm584_vm15, %v626_v18, 0.0  ;;  %v637_v25 = vsel %vm588_vm0, %v626_v18, 0.0  ;;  %v514_v12 = vld [vmem:[%s4198_s23 + $0xe8] sm:$0xff]  ;;  %v515_v13 = vld [vmem:[%s4198_s23 + $0xf0] sm:$0xff]  ;;  %v521_v23 = vld [vmem:[%s4369_s11 + $0x20] sm:$0xff] }
  0x5c   : > { %vm678_vm1 = vcmp.eq.s32.totalorder %v4089_v21, %v671_v20  ;;  %vm682_vm2 = vcmp.eq.s32.totalorder %v4107_v32, %v671_v20  ;;  %v734_v29 = vsel %vm685_vm14, %v4122_v41, 0.0  ;;  %vm593_vm3 = vcmp.eq.s32.totalorder %v4116_v37, %v4134_v50  ;;  %v488_v50 = vld [vmem:[%s4198_s23 + $0x18] sm:$0xff] }
  0x5d   : > { %v3613_v30 = vpack.c.bf16 %v741_v27, %v737_v26  ;;  %v727_v31 = vsel %vm678_vm1, %v720_v15, 0.0  ;;  %v731_v33 = vsel %vm682_vm2, %v720_v15, 0.0  ;;  %v746_v34 = vadd.f32 %v734_v29, %v640_v22  ;;  %v517_v22 = vld [vmem:[%s4369_s11] sm:$0xff]  ;;  %v516_v24 = vld [vmem:[%s4198_s23 + $0xf8] sm:$0xff] }
  0x5e   : > { %v739_v35 = vadd.f32 %v727_v31, %v633_v28  ;;  %v743_v36 = vadd.f32 %v731_v33, %v637_v25  ;;  %v642_v38 = vsel %vm593_vm3, %v4137_v51, 0.0  ;;  %vm687_vm4 = vcmp.eq.s32.totalorder %v4116_v37, %v4148_v55  ;;  %v489_v51 = vld [vmem:[%s4198_s23 + $0x20] sm:$0xff]  ;;  %v519_v28 = vld [vmem:[%s4369_s11 + $0x10] sm:$0xff] }
  0x5f   : > { %3614 = vmatpush1.bf16.msra.mxu0 %v3613_v30  ;;  %v736_v39 = vsel %vm687_vm4, %v4127_v44, 0.0  ;;  %vm590_vm5 = vcmp.eq.s32.totalorder %v4116_v37, %v4140_v52  ;;  %vm684_vm6 = vcmp.eq.s32.totalorder %v4116_v37, %v663_v14  ;;  %vm592_vm7 = vcmp.eq.s32.totalorder %v4116_v37, %v577_v17  ;;  %v485_v44 = vld [vmem:[%s4198_s23] sm:$0xff]  ;;  %v490_v52 = vld [vmem:[%s4198_s23 + $0x28] sm:$0xff]  ;;  %v520_v17 = vld [vmem:[%s4369_s11 + $0x18] sm:$0xff] }
  0x60   : > { %v3617_v40 = vpack.c.bf16 %v743_v36, %v739_v35  ;;  %3492 = vmatprep.subr.msk.mxu0 %vm1025_vm10, %v746_v34  ;;  %v748_v41 = vadd.f32 %v736_v39, %v642_v38  ;;  %v639_v42 = vsel %vm590_vm5, %v618_v5, 0.0  ;;  %v733_v43 = vsel %vm684_vm6, %v712_v7, 0.0  ;;  %v493_v55 = vld [vmem:[%s4198_s23 + $0x40] sm:$0xff]  ;;  %v507_v5 = vld [vmem:[%s4198_s23 + $0xb0] sm:$0xff]  ;;  %v518_v14 = vld [vmem:[%s4369_s11 + $0x8] sm:$0xff] }
  0x61   : > { %v745_v45 = vadd.f32 %v733_v43, %v639_v42  ;;  %v641_v46 = vsel %vm592_vm7, %v626_v18, 0.0  ;;  %vm686_vm8 = vcmp.eq.s32.totalorder %v4116_v37, %v671_v20  ;;  %vm928_vm9 = vcmask 162816   ;;  %v487_v37 = vld [vmem:[%s4198_s23 + $0x10] sm:$0xff]  ;;  %v509_v7 = vld [vmem:[%s4198_s23 + $0xc0] sm:$0xff]  ;;  %v524_v20 = vld [vmem:[%s4369_s11 + $0x38] sm:$0xff] }
  0x62   : > { %3618 = vmatpush1.bf16.msra.mxu1 %v3617_v40  ;;  %v735_v47 = vsel %vm686_vm8, %v720_v15, 0.0  ;;  %v522_v15 = vld [vmem:[%s4369_s11 + $0x28] sm:$0xff]  ;;  %v3627_v26 = vpack.c.bf16 %v524_v20, %v520_v17  ;;  %v3621_v27 = vpack.c.bf16 %v521_v23, %v517_v22  ;;  %v523_v25 = vld [vmem:[%s4369_s11 + $0x30] sm:$0xff]  ;;  %v536_v30 = vmul.f32 6.0, %v4086_v19 }
  0x63   : > { %3526 = vmatprep.subr.msk.mxu1 %vm1025_vm10, %v748_v41  ;;  %3493 = vmatpush1.msk.msra.mxu0 %vm1025_vm10, %v745_v45  ;;  %v747_v48 = vadd.f32 %v735_v47, %v641_v46  ;;  %v3619_v18 = vpack.c.bf16 %v522_v15, %v518_v14  ;;  %v3629_v29 = vpack.c.bf16 %v523_v25, %v519_v28  ;;  %v4393_v38 = vsub.s32 1, %v4089_v21  ;;  %v526_v43 = vld [vmem:[%s4369_s11 + $0x48] sm:$0xff]  ;;  %v528_v46 = vld [vmem:[%s4369_s11 + $0x58] sm:$0xff] }
  0x64   : > { %3494 = vmatmul.mubr.msk.f32.vlgmr.msra.gmra.mrb[0].mxu0 %vm928_vm9, %v485_v44  ;;  %v3491_v31 = vadd.f32 -0.5, %v536_v30  ;;  %v755_v40 = vsub.s32 3, %v4089_v21  ;;  %v530_v45 = vld [vmem:[%s4369_s11 + $0x68] sm:$0xff] }
  0x65   : > { %1108 = vmatprep.mubr.f32.mxu0 %v5220_v16  ;;  %3620 = vmatprep.subr.bf16.mxu0 %v3619_v18  ;;  %v3623_v47 = vpack.c.bf16 %v530_v45, %v526_v43 }
  0x66   : > { %3527 = vmatpush1.msk.msra.mxu1 %vm1025_vm10, %v747_v48  ;;  %3622 = vmatpush1.bf16.msra.mxu0 %v3621_v27  ;;  %v539_v33 = vfloor.f32 %v3491_v31  ;;  %v532_v48 = vld [vmem:[%s4369_s11 + $0x78] sm:$0xff] }
  0x67   : > { %3528 = vmatmul.mubr.msk.f32.vlgmr.msra.gmra.mrb[0].mxu1 %vm928_vm9, %v485_v44  ;;  %3628 = vmatprep.subr.bf16.mxu1 %v3627_v26  ;;  %v759_v44 = vsub.s32 5, %v4089_v21 }
  0x68   : > { %1365 = vmatprep.mubr.f32.mxu1 %v5220_v16  ;;  %3495 = vmatmul.mubr.msk.f32.gmra.mrb[2].mxu0 %vm928_vm9, %v486_v49  ;;  %v3705_v34 = vtrunc.f32 %v539_v33  ;;  %v4390_v36 = vsub.f32 %v3491_v31, %v539_v33 }
  0x69   : > { %1114 = vmatprep.mubr.f32.mxu0 %v5220_v16  ;;  %3630 = vmatpush1.bf16.msra.mxu1 %v3629_v29 }
  0x6a   : > { %v3706_v35 = vcvt.f32.s32 %v3705_v34  ;;  %v545_v41 = vsub.f32 1.0, %v4390_v36  ;;  %3624 = vmatprep.subr.bf16.mxu0 %v3623_v47 }
  0x6b   : > { %3529 = vmatmul.mubr.msk.f32.gmra.mrb[2].mxu1 %vm928_vm9, %v486_v49  ;;  %v525_v49 = vld [vmem:[%s4369_s11 + $0x40] sm:$0xff] }
  0x6c   : > { %1371 = vmatprep.mubr.f32.mxu1 %v5220_v16  ;;  %3496 = vmatmul.mubr.msk.f32.gmra.mrb[4].mxu0 %vm928_vm9, %v487_v37  ;;  %v834_v39 = vadd.s32 1, %v3706_v35  ;;  %v752_v19 = vrot.slane %v3706_v35, %v4393_v38 }
  0x6d   : > { %1120 = vmatprep.mubr.f32.mxu0 %v5220_v16 }
  0x6e   : > { %v838_v42 = vrot.slane %v834_v39, %v4393_v38 }
  0x6f   : > { %3530 = vmatmul.mubr.msk.f32.gmra.mrb[4].mxu1 %vm928_vm9, %v487_v37  ;;  %v529_v37 = vld [vmem:[%s4369_s11 + $0x60] sm:$0xff] }
  0x70   : > { %1377 = vmatprep.mubr.f32.mxu1 %v5220_v16  ;;  %3497 = vmatmul.mubr.msk.f32.gmra.mrb[6].mxu0 %vm928_vm9, %v488_v50 }
  0x71   : > { %1126 = vmatprep.mubr.f32.mxu0 %v5220_v16 }
  0x73   : > { %3531 = vmatmul.mubr.msk.f32.gmra.mrb[6].mxu1 %vm928_vm9, %v488_v50  ;;  %v756_v50 = vrot.slane %v3706_v35, %v755_v40 }
  0x74   : > { %1383 = vmatprep.mubr.f32.mxu1 %v5220_v16  ;;  %3498 = vmatmul.mubr.msk.f32.gmra.mrb[8].mxu0 %vm928_vm9, %v489_v51 }
  0x75   : > { %1132 = vmatprep.mubr.f32.mxu0 %v5220_v16 }
  0x77   : > { %3532 = vmatmul.mubr.msk.f32.gmra.mrb[8].mxu1 %vm928_vm9, %v489_v51  ;;  %v842_v51 = vrot.slane %v834_v39, %v755_v40 }
  0x78   : > { %1389 = vmatprep.mubr.f32.mxu1 %v5220_v16  ;;  %3499 = vmatmul.mubr.msk.f32.gmra.mrb[10].mxu0 %vm928_vm9, %v490_v52 }
  0x79   : > { %1138 = vmatprep.mubr.f32.mxu0 %v5220_v16 }
  0x7b   : > { %3533 = vmatmul.mubr.msk.f32.gmra.mrb[10].mxu1 %vm928_vm9, %v490_v52  ;;  %v3631_v52 = vpack.c.bf16 %v532_v48, %v528_v46 }
  0x7c   : > { %1395 = vmatprep.mubr.f32.mxu1 %v5220_v16  ;;  %3500 = vmatmul.mubr.msk.f32.gmra.mrb[12].mxu0 %vm928_vm9, %v491_v53 }
  0x7d   : > { %1144 = vmatprep.mubr.f32.mxu0 %v5220_v16  ;;  %3632 = vmatprep.subr.bf16.mxu1 %v3631_v52 }
  0x7f   : > { %3534 = vmatmul.mubr.msk.f32.gmra.mrb[12].mxu1 %vm928_vm9, %v491_v53  ;;  %v3625_v53 = vpack.c.bf16 %v529_v37, %v525_v49 }
  0x80   : > { %1401 = vmatprep.mubr.f32.mxu1 %v5220_v16  ;;  %3501 = vmatmul.mubr.msk.f32.gmra.mrb[14].mxu0 %vm928_vm9, %v492_v54 }
  0x81   : > { %1150 = vmatprep.mubr.f32.mxu0 %v5220_v16  ;;  %3626 = vmatpush1.bf16.msra.mxu0 %v3625_v53 }
  0x83   : > { %3535 = vmatmul.mubr.msk.f32.gmra.mrb[14].mxu1 %vm928_vm9, %v492_v54  ;;  %v527_v54 = vld [vmem:[%s4369_s11 + $0x50] sm:$0xff] }
  0x84   : > { %1407 = vmatprep.mubr.f32.mxu1 %v5220_v16  ;;  %3502 = vmatmul.mubr.msk.f32.gmra.mrb[16].mxu0 %vm928_vm9, %v493_v55 }
  0x85   : > { %1156 = vmatprep.mubr.f32.mxu0 %v5220_v16 }
  0x87   : > { %3536 = vmatmul.mubr.msk.f32.gmra.mrb[16].mxu1 %vm928_vm9, %v493_v55  ;;  %v531_v55 = vld [vmem:[%s4369_s11 + $0x70] sm:$0xff] }
  0x88   : > { %1413 = vmatprep.mubr.f32.mxu1 %v5220_v16  ;;  %3503 = vmatmul.mubr.msk.f32.gmra.mrb[18].mxu0 %vm928_vm9, %v494_v56 }
  0x89   : > { %1162 = vmatprep.mubr.f32.mxu0 %v5220_v16 }
  0x8b   : > { %3537 = vmatmul.mubr.msk.f32.gmra.mrb[18].mxu1 %vm928_vm9, %v494_v56  ;;  %v793_v56 = vrot.slane %v545_v41, %v4393_v38 }
  0x8c   : > { %1419 = vmatprep.mubr.f32.mxu1 %v5220_v16  ;;  %3504 = vmatmul.mubr.msk.f32.gmra.mrb[20].mxu0 %vm928_vm9, %v495_v57 }
  0x8d   : > { %1168 = vmatprep.mubr.f32.mxu0 %v5220_v16 }
  0x8f   : > { %3538 = vmatmul.mubr.msk.f32.gmra.mrb[20].mxu1 %vm928_vm9, %v495_v57  ;;  %v879_v57 = vrot.slane %v4390_v36, %v4393_v38 }
  0x90   : > { %1425 = vmatprep.mubr.f32.mxu1 %v5220_v16  ;;  %3505 = vmatmul.mubr.msk.f32.gmra.mrb[22].mxu0 %vm928_vm9, %v496_v58 }
  0x91   : > { %1174 = vmatprep.mubr.f32.mxu0 %v5220_v16 }
  0x93   : > { %3539 = vmatmul.mubr.msk.f32.gmra.mrb[22].mxu1 %vm928_vm9, %v496_v58  ;;  %v763_v58 = vsub.s32 7, %v4089_v21 }
  0x94   : > { %1431 = vmatprep.mubr.f32.mxu1 %v5220_v16  ;;  %3506 = vmatmul.mubr.msk.f32.gmra.mrb[24].mxu0 %vm928_vm9, %v497_v59 }
  0x95   : > { %1180 = vmatprep.mubr.f32.mxu0 %v5220_v16  ;;  %v805_v14 = vrot.slane %v545_v41, %v763_v58  ;;  %v891_v15 = vrot.slane %v4390_v36, %v763_v58 }
  0x97   : > { %3540 = vmatmul.mubr.msk.f32.gmra.mrb[24].mxu1 %vm928_vm9, %v497_v59  ;;  %v3633_v59 = vpack.c.bf16 %v531_v55, %v527_v54  ;;  %v825_v28 = vrot.slane %v805_v14, %v4393_v38  ;;  %v911_v25 = vrot.slane %v891_v15, %v4393_v38 }
  0x98   : > { %1437 = vmatprep.mubr.f32.mxu1 %v5220_v16  ;;  %3507 = vmatmul.mubr.msk.f32.gmra.mrb[26].mxu0 %vm928_vm9, %v498_v60 }
  0x99   : > { %1186 = vmatprep.mubr.f32.mxu0 %v5220_v16  ;;  %3634 = vmatpush1.bf16.msra.mxu1 %v3633_v59 }
  0x9b   : > { %3541 = vmatmul.mubr.msk.f32.gmra.mrb[26].mxu1 %vm928_vm9, %v498_v60  ;;  %v768_v60 = vrot.slane %v752_v19, %v4393_v38 }
  0x9c   : > { %1443 = vmatprep.mubr.f32.mxu1 %v5220_v16  ;;  %3508 = vmatmul.mubr.msk.f32.gmra.mrb[28].mxu0 %vm928_vm9, %v499_v61 }
  0x9d   : > { %1192 = vmatprep.mubr.f32.mxu0 %v5220_v16  ;;  %vm781_vm11 = vcmp.eq.s32.totalorder %v4089_v21, %v768_v60  ;;  %vm785_vm1 = vcmp.eq.s32.totalorder %v4107_v32, %v768_v60 }
  0x9f   : > { %3542 = vmatmul.mubr.msk.f32.gmra.mrb[28].mxu1 %vm928_vm9, %v499_v61  ;;  %v854_v61 = vrot.slane %v838_v42, %v4393_v38 }
  0xa0   : > { %1449 = vmatprep.mubr.f32.mxu1 %v5220_v16  ;;  %3509 = vmatmul.mubr.msk.f32.gmra.mrb[30].mxu0 %vm928_vm9, %v500_v62 }
  0xa1   : > { %1198 = vmatprep.mubr.f32.mxu0 %v5220_v16  ;;  %vm867_vm12 = vcmp.eq.s32.totalorder %v4089_v21, %v854_v61  ;;  %vm871_vm2 = vcmp.eq.s32.totalorder %v4107_v32, %v854_v61 }
  0xa3   : > { %3543 = vmatmul.mubr.msk.f32.gmra.mrb[30].mxu1 %vm928_vm9, %v500_v62  ;;  %v760_v62 = vrot.slane %v3706_v35, %v759_v44 }
  0xa4   : > { %1455 = vmatprep.mubr.f32.mxu1 %v5220_v16  ;;  %3510 = vmatmul.mubr.msk.f32.gmra.mrb[32].mxu0 %vm928_vm9, %v501_v63 }
  0xa5   : > { %1204 = vmatprep.mubr.f32.mxu0 %v5220_v16 }
  0xa7   : > { %3544 = vmatmul.mubr.msk.f32.gmra.mrb[32].mxu1 %vm928_vm9, %v501_v63  ;;  %v846_v63 = vrot.slane %v834_v39, %v759_v44 }
  0xa8   : > { %1461 = vmatprep.mubr.f32.mxu1 %v5220_v16  ;;  %3511 = vmatmul.mubr.msk.f32.gmra.mrb[34].mxu0 %vm928_vm9, %v502_v0 }
  0xa9   : > { %1210 = vmatprep.mubr.f32.mxu0 %v5220_v16 }
  0xab   : > { %3545 = vmatmul.mubr.msk.f32.gmra.mrb[34].mxu1 %vm928_vm9, %v502_v0  ;;  %v797_v0 = vrot.slane %v545_v41, %v755_v40 }
  0xac   : > { %1467 = vmatprep.mubr.f32.mxu1 %v5220_v16  ;;  %3512 = vmatmul.mubr.msk.f32.gmra.mrb[36].mxu0 %vm928_vm9, %v503_v1 }
  0xad   : > { %1216 = vmatprep.mubr.f32.mxu0 %v5220_v16 }
  0xaf   : > { %3546 = vmatmul.mubr.msk.f32.gmra.mrb[36].mxu1 %vm928_vm9, %v503_v1  ;;  %v883_v1 = vrot.slane %v4390_v36, %v755_v40 }
  0xb0   : > { %1473 = vmatprep.mubr.f32.mxu1 %v5220_v16  ;;  %3513 = vmatmul.mubr.msk.f32.gmra.mrb[38].mxu0 %vm928_vm9, %v504_v2 }
  0xb1   : > { %1222 = vmatprep.mubr.f32.mxu0 %v5220_v16 }
  0xb3   : > { %3547 = vmatmul.mubr.msk.f32.gmra.mrb[38].mxu1 %vm928_vm9, %v504_v2  ;;  %v772_v2 = vrot.slane %v756_v50, %v4393_v38 }
  0xb4   : > { %1479 = vmatprep.mubr.f32.mxu1 %v5220_v16  ;;  %3514 = vmatmul.mubr.msk.f32.gmra.mrb[40].mxu0 %vm928_vm9, %v505_v3 }
  0xb5   : > { %1228 = vmatprep.mubr.f32.mxu0 %v5220_v16  ;;  %vm782_vm13 = vcmp.eq.s32.totalorder %v4089_v21, %v772_v2  ;;  %vm786_vm5 = vcmp.eq.s32.totalorder %v4107_v32, %v772_v2 }
  0xb7   : > { %3548 = vmatmul.mubr.msk.f32.gmra.mrb[40].mxu1 %vm928_vm9, %v505_v3  ;;  %v858_v3 = vrot.slane %v842_v51, %v4393_v38 }
  0xb8   : > { %1485 = vmatprep.mubr.f32.mxu1 %v5220_v16  ;;  %3515 = vmatmul.mubr.msk.f32.gmra.mrb[42].mxu0 %vm928_vm9, %v506_v4 }
  0xb9   : > { %1234 = vmatprep.mubr.f32.mxu0 %v5220_v16  ;;  %vm868_vm14 = vcmp.eq.s32.totalorder %v4089_v21, %v858_v3  ;;  %vm872_vm6 = vcmp.eq.s32.totalorder %v4107_v32, %v858_v3 }
  0xbb   : > { %3549 = vmatmul.mubr.msk.f32.gmra.mrb[42].mxu1 %vm928_vm9, %v506_v4  ;;  %v813_v4 = vrot.slane %v793_v56, %v4393_v38 }
  0xbc   : > { %1491 = vmatprep.mubr.f32.mxu1 %v5220_v16  ;;  %3516 = vmatmul.mubr.msk.f32.gmra.mrb[44].mxu0 %vm928_vm9, %v507_v5 }
  0xbd   : > { %1240 = vmatprep.mubr.f32.mxu0 %v5220_v16  ;;  %v826_v20 = vsel %vm781_vm11, %v813_v4, 0.0  ;;  %v830_v34 = vsel %vm785_vm1, %v813_v4, 0.0  ;;  %vm2435_vm1 = vcmask 1046534  }
  0xbf   : > { %3550 = vmatmul.mubr.msk.f32.gmra.mrb[44].mxu1 %vm928_vm9, %v507_v5  ;;  %v899_v5 = vrot.slane %v879_v57, %v4393_v38 }
  0xc0   : > { %1497 = vmatprep.mubr.f32.mxu1 %v5220_v16  ;;  %3517 = vmatmul.mubr.msk.f32.gmra.mrb[46].mxu0 %vm928_vm9, %v508_v6 }
  0xc1   : > { %1246 = vmatprep.mubr.f32.mxu0 %v5220_v16  ;;  %v912_v22 = vsel %vm867_vm12, %v899_v5, 0.0  ;;  %vm2425_vm12 = vcmask 1041409  }
  0xc2   : > { %v4441_v29 = vadd.f32 %v912_v22, %v826_v20 }
  0xc3   : > { %3551 = vmatmul.mubr.msk.f32.gmra.mrb[46].mxu1 %vm928_vm9, %v508_v6  ;;  %v764_v6 = vrot.slane %v3706_v35, %v763_v58  ;;  %v916_v35 = vsel %vm871_vm2, %v899_v5, 0.0  ;;  %vm2140_vm2 = vcmask 261120  }
  0xc4   : > { %1503 = vmatprep.mubr.f32.mxu1 %v5220_v16  ;;  %3518 = vmatmul.mubr.msk.f32.gmra.mrb[48].mxu0 %vm928_vm9, %v509_v7  ;;  %v4453_v19 = vadd.f32 %v916_v35, %v830_v34 }
  0xc5   : > { %1252 = vmatprep.mubr.f32.mxu0 %v5220_v16  ;;  %v780_v17 = vrot.slane %v764_v6, %v4393_v38 }
  0xc7   : > { %3552 = vmatmul.mubr.msk.f32.gmra.mrb[48].mxu1 %vm928_vm9, %v509_v7  ;;  %v850_v7 = vrot.slane %v834_v39, %v763_v58  ;;  %vm784_vm3 = vcmp.eq.s32.totalorder %v4089_v21, %v780_v17 }
  0xc8   : > { %1509 = vmatprep.mubr.f32.mxu1 %v5220_v16  ;;  %3519 = vmatmul.mubr.msk.f32.gmra.mrb[50].mxu0 %vm928_vm9, %v510_v8 }
  0xc9   : > { %1258 = vmatprep.mubr.f32.mxu0 %v5220_v16  ;;  %v866_v18 = vrot.slane %v850_v7, %v4393_v38 }
  0xcb   : > { %3553 = vmatmul.mubr.msk.f32.gmra.mrb[50].mxu1 %vm928_vm9, %v510_v8  ;;  %v801_v8 = vrot.slane %v545_v41, %v759_v44  ;;  %vm870_vm4 = vcmp.eq.s32.totalorder %v4089_v21, %v866_v18  ;;  %vm874_vm11 = vcmp.eq.s32.totalorder %v4107_v32, %v866_v18 }
  0xcc   : > { %1515 = vmatprep.mubr.f32.mxu1 %v5220_v16  ;;  %3520 = vmatmul.mubr.msk.f32.gmra.mrb[52].mxu0 %vm928_vm9, %v511_v9  ;;  %v919_v37 = vsel %vm874_vm11, %v911_v25, 0.0 }
  0xcd   : > { %1264 = vmatprep.mubr.f32.mxu0 %v5220_v16  ;;  %v821_v23 = vrot.slane %v801_v8, %v4393_v38 }
  0xcf   : > { %3554 = vmatmul.mubr.msk.f32.gmra.mrb[52].mxu1 %vm928_vm9, %v511_v9  ;;  %v887_v9 = vrot.slane %v4390_v36, %v759_v44  ;;  %v829_v36 = vsel %vm784_vm3, %v825_v28, 0.0  ;;  %vm2437_vm3 = vcmask 1047559  }
  0xd0   : > { %1521 = vmatprep.mubr.f32.mxu1 %v5220_v16  ;;  %3521 = vmatmul.mubr.msk.f32.gmra.mrb[54].mxu0 %vm928_vm9, %v512_v10 }
  0xd1   : > { %1270 = vmatprep.mubr.f32.mxu0 %v5220_v16 }
  0xd3   : > { %3555 = vmatmul.mubr.msk.f32.gmra.mrb[54].mxu1 %vm928_vm9, %v512_v10  ;;  %v776_v10 = vrot.slane %v760_v62, %v4393_v38 }
  0xd4   : > { %1527 = vmatprep.mubr.f32.mxu1 %v5220_v16  ;;  %3522 = vmatmul.mubr.msk.f32.gmra.mrb[56].mxu0 %vm928_vm9, %v513_v11 }
  0xd5   : > { %1276 = vmatprep.mubr.f32.mxu0 %v5220_v16  ;;  %vm783_vm15 = vcmp.eq.s32.totalorder %v4089_v21, %v776_v10  ;;  %vm787_vm7 = vcmp.eq.s32.totalorder %v4107_v32, %v776_v10 }
  0xd6   : > { %v828_v30 = vsel %vm783_vm15, %v821_v23, 0.0  ;;  %v832_v46 = vsel %vm787_vm7, %v821_v23, 0.0  ;;  %vm2431_vm15 = vcmask 1044484  }
  0xd7   : > { %3556 = vmatmul.mubr.msk.f32.gmra.mrb[56].mxu1 %vm928_vm9, %v513_v11  ;;  %v862_v11 = vrot.slane %v846_v63, %v4393_v38 }
  0xd8   : > { %1533 = vmatprep.mubr.f32.mxu1 %v5220_v16  ;;  %3523 = vmatmul.mubr.msk.f32.gmra.mrb[58].mxu0 %vm928_vm9, %v514_v12 }
  0xd9   : > { %1282 = vmatprep.mubr.f32.mxu0 %v5220_v16  ;;  %vm869_vm0 = vcmp.eq.s32.totalorder %v4089_v21, %v862_v11  ;;  %vm873_vm8 = vcmp.eq.s32.totalorder %v4107_v32, %v862_v11 }
  0xdb   : > { %3557 = vmatmul.mubr.msk.f32.gmra.mrb[58].mxu1 %vm928_vm9, %v514_v12  ;;  %v817_v12 = vrot.slane %v797_v0, %v4393_v38 }
  0xdc   : > { %1539 = vmatprep.mubr.f32.mxu1 %v5220_v16  ;;  %3524 = vmatmul.mubr.msk.f32.gmra.mrb[60].mxu0 %vm928_vm9, %v515_v13 }
  0xdd   : > { %1288 = vmatprep.mubr.f32.mxu0 %v5220_v16  ;;  %v827_v26 = vsel %vm782_vm13, %v817_v12, 0.0  ;;  %v831_v39 = vsel %vm786_vm5, %v817_v12, 0.0  ;;  %vm2427_vm13 = vcmask 1042434   ;;  %vm2815_vm5 = vcmask 392192  }
  0xdf   : > { %3558 = vmatmul.mubr.msk.f32.gmra.mrb[60].mxu1 %vm928_vm9, %v515_v13  ;;  %v903_v13 = vrot.slane %v883_v1, %v4393_v38 }
  0xe0   : > { %1545 = vmatprep.mubr.f32.mxu1 %v5220_v16  ;;  %3525 = vmatmul.mubr.msk.f32.gmra.mrb[62].mxu0 %vm928_vm9, %v516_v24 }
  0xe1   : > { %2223 = vmatprep.mubr.f32.mxu0 %v5220_v16  ;;  %v913_v27 = vsel %vm868_vm14, %v903_v13, 0.0  ;;  %v917_v21 = vsel %vm872_vm6, %v903_v13, 0.0  ;;  %vm2429_vm14 = vcmask 1043459   ;;  %vm3908_vm6 = vmmov 1  }
  0xe2   : > { %v4445_v33 = vadd.f32 %v913_v27, %v827_v26  ;;  %v4459_v48 = vadd.f32 %v917_v21, %v831_v39  ;;  %vm3668_vm7 = vmpackc.low %vm1025_vm10, %vm3908_vm6 }
  0xe3   : > { %3559 = vmatmul.mubr.msk.f32.gmra.mrb[62].mxu1 %vm928_vm9, %v516_v24  ;;  %v907_v24 = vrot.slane %v887_v9, %v4393_v38  ;;  %v915_v38 = vsel %vm870_vm4, %v911_v25, 0.0  ;;  %vm788_vm9 = vcmp.eq.s32.totalorder %v4107_v32, %v780_v17  ;;  %vm2496_vm4 = vcmask 130048  }
  0xe4   : > { %2324 = vmatprep.mubr.f32.mxu1 %v5220_v16  ;;  %v4456_v45 = vadd.f32 %v915_v38, %v829_v36  ;;  %v833_v49 = vsel %vm788_vm9, %v825_v28, 0.0 }
  0xe5   : > { %v914_v31 = vsel %vm869_vm0, %v907_v24, 0.0  ;;  %v918_v44 = vsel %vm873_vm8, %v907_v24, 0.0  ;;  %v4466_v57 = vadd.f32 %v919_v37, %v833_v49  ;;  %vm2433_vm0 = vcmask 1045509  }
  0xe6   : > { %v4451_v41 = vadd.f32 %v914_v31, %v828_v30  ;;  %v4462_v53 = vadd.f32 %v918_v44, %v832_v46  ;;  %vm3026_vm8 = vcmask 97280  }
 0x137   : > { %v1104_v40 = vpop.f32.mrb[0].mxu0 }
 0x138   : > { %v1552_v42 = vmul.f32 %v1104_v40, %v4441_v29  ;;  %v1106_v43 = vpop.f32.mrb[1].mxu0 }
 0x139   : > { %v1553_v47 = vmul.f32 %v1106_v43, %v4445_v33 }
 0x13a   : > { %v1361_v50 = vpop.f32.mrb[0].mxu1 }
 0x13b   : > { %v1554_v32 = vmul.f32 %v1361_v50, %v4451_v41  ;;  %v1363_v51 = vpop.f32.mrb[1].mxu1  ;;  %v1110_v52 = vpop.f32.mrb[2].mxu0 }
 0x13c   : > { %v1555_v54 = vmul.f32 %v1363_v51, %v4456_v45  ;;  %v1556_v55 = vmul.f32 %v1110_v52, %v4453_v19  ;;  %v1112_v56 = vpop.f32.mrb[3].mxu0 }
 0x13d   : > { %v1557_v58 = vmul.f32 %v1112_v56, %v4459_v48 }
 0x13e   : > { %v1680_v59 = vadd.f32 %v1556_v55, %v1552_v42  ;;  %v1367_v60 = vpop.f32.mrb[2].mxu1 }
 0x13f   : > { %v1558_v61 = vmul.f32 %v1367_v60, %v4462_v53  ;;  %v1687_v62 = vadd.f32 %v1557_v58, %v1553_v47  ;;  %v1369_v63 = vpop.f32.mrb[3].mxu1  ;;  %v1116_v0 = vpop.f32.mrb[4].mxu0 }
 0x140   : > { %v1681_v1 = vrot.slane %v1680_v59, 4  ;;  %v1559_v2 = vmul.f32 %v1369_v63, %v4466_v57  ;;  %v1560_v3 = vmul.f32 %v1116_v0, %v4441_v29  ;;  %v1118_v4 = vpop.f32.mrb[5].mxu0 }
 0x141   : > { %v1694_v5 = vadd.f32 %v1558_v61, %v1554_v32  ;;  %v1688_v6 = vrot.slane %v1687_v62, 4  ;;  %v1561_v7 = vmul.f32 %v1118_v4, %v4445_v33 }
 0x142   : > { %v1682_v8 = vadd.f32 %v1681_v1, %v1680_v59  ;;  %v1701_v9 = vadd.f32 %v1559_v2, %v1555_v54  ;;  %v1373_v10 = vpop.f32.mrb[4].mxu1 }
 0x143   : > { %v1695_v11 = vrot.slane %v1694_v5, 4  ;;  %v1689_v12 = vadd.f32 %v1688_v6, %v1687_v62  ;;  %v1562_v13 = vmul.f32 %v1373_v10, %v4451_v41  ;;  %v1375_v14 = vpop.f32.mrb[5].mxu1  ;;  %v1122_v15 = vpop.f32.mrb[6].mxu0 }
 0x144   : > { %v1683_v17 = vrot.slane %v1682_v8, 2  ;;  %v1702_v18 = vrot.slane %v1701_v9, 4  ;;  %v1563_v20 = vmul.f32 %v1375_v14, %v4456_v45  ;;  %v1564_v22 = vmul.f32 %v1122_v15, %v4453_v19  ;;  %v1124_v23 = vpop.f32.mrb[7].mxu0 }
 0x145   : > { %v1696_v24 = vadd.f32 %v1695_v11, %v1694_v5  ;;  %v1690_v26 = vrot.slane %v1689_v12, 2  ;;  %v1565_v27 = vmul.f32 %v1124_v23, %v4459_v48 }
 0x146   : > { %v1684_v28 = vadd.f32 %v1683_v17, %v1682_v8  ;;  %v1703_v25 = vadd.f32 %v1702_v18, %v1701_v9  ;;  %v1708_v30 = vadd.f32 %v1564_v22, %v1560_v3  ;;  %v1379_v31 = vpop.f32.mrb[6].mxu1 }
 0x147   : > { %v1697_v34 = vrot.slane %v1696_v24, 2  ;;  %v1691_v35 = vadd.f32 %v1690_v26, %v1689_v12  ;;  %v1566_v36 = vmul.f32 %v1379_v31, %v4462_v53  ;;  %v1715_v38 = vadd.f32 %v1565_v27, %v1561_v7  ;;  %v1381_v39 = vpop.f32.mrb[7].mxu1  ;;  %v1128_v21 = vpop.f32.mrb[8].mxu0 }
 0x148   : > { %v1685_v40 = vrot.slane %v1684_v28, 1  ;;  %v1704_v42 = vrot.slane %v1703_v25, 2  ;;  %v1709_v43 = vrot.slane %v1708_v30, 4  ;;  %v1567_v46 = vmul.f32 %v1381_v39, %v4466_v57  ;;  %v1130_v44 = vpop.f32.mrb[9].mxu0 }
 0x149   : > { %v1698_v47 = vadd.f32 %v1697_v34, %v1696_v24  ;;  %v1692_v49 = vrot.slane %v1691_v35, 1  ;;  %v1722_v37 = vadd.f32 %v1566_v36, %v1562_v13  ;;  %v1716_v50 = vrot.slane %v1715_v38, 4 }
 0x14a   : > { %v1686_v32 = vadd.f32 %v1685_v40, %v1684_v28  ;;  %v1705_v51 = vadd.f32 %v1704_v42, %v1703_v25  ;;  %v1710_v52 = vadd.f32 %v1709_v43, %v1708_v30  ;;  %v1729_v54 = vadd.f32 %v1567_v46, %v1563_v20  ;;  %v1385_v55 = vpop.f32.mrb[8].mxu1 }
 0x14b   : > { %v1699_v56 = vrot.slane %v1698_v47, 1  ;;  %v1693_v58 = vadd.f32 %v1692_v49, %v1691_v35  ;;  %v1723_v59 = vrot.slane %v1722_v37, 4  ;;  %v1717_v60 = vadd.f32 %v1716_v50, %v1715_v38  ;;  %v1387_v61 = vpop.f32.mrb[9].mxu1  ;;  %v1134_v62 = vpop.f32.mrb[10].mxu0 }
 0x14c   : > { %v1706_v63 = vrot.slane %v1705_v51, 1  ;;  %v1711_v0 = vrot.slane %v1710_v52, 2  ;;  %v1730_v1 = vrot.slane %v1729_v54, 4  ;;  %v1568_v2 = vmul.f32 %v1128_v21, %v4441_v29  ;;  %v1136_v3 = vpop.f32.mrb[11].mxu0 }
 0x14d   : > { %v1700_v4 = vadd.f32 %v1699_v56, %v1698_v47  ;;  %v1724_v5 = vadd.f32 %v1723_v59, %v1722_v37  ;;  %v1718_v6 = vrot.slane %v1717_v60, 2  ;;  %v1570_v7 = vmul.f32 %v1385_v55, %v4451_v41 }
 0x14e   : > { %v1707_v8 = vadd.f32 %v1706_v63, %v1705_v51  ;;  %v1712_v9 = vadd.f32 %v1711_v0, %v1710_v52  ;;  %v1731_v10 = vadd.f32 %v1730_v1, %v1729_v54  ;;  %v1569_v11 = vmul.f32 %v1130_v44, %v4445_v33  ;;  %v1391_v12 = vpop.f32.mrb[10].mxu1 }
 0x14f   : > { %v1725_v13 = vrot.slane %v1724_v5, 2  ;;  %v1719_v14 = vadd.f32 %v1718_v6, %v1717_v60  ;;  %v1571_v15 = vmul.f32 %v1387_v61, %v4456_v45  ;;  %v1572_v17 = vmul.f32 %v1134_v62, %v4453_v19  ;;  %v1393_v18 = vpop.f32.mrb[11].mxu1  ;;  %v1140_v20 = vpop.f32.mrb[12].mxu0 }
 0x150   : > { %v1713_v22 = vrot.slane %v1712_v9, 1  ;;  %v1732_v23 = vrot.slane %v1731_v10, 2  ;;  %v1574_v24 = vmul.f32 %v1391_v12, %v4462_v53  ;;  %v1573_v26 = vmul.f32 %v1136_v3, %v4459_v48  ;;  %v1142_v27 = vpop.f32.mrb[13].mxu0 }
 0x151   : > { %v1726_v28 = vadd.f32 %v1725_v13, %v1724_v5  ;;  %v1720_v25 = vrot.slane %v1719_v14, 1  ;;  %v1736_v30 = vadd.f32 %v1572_v17, %v1568_v2  ;;  %v1575_v31 = vmul.f32 %v1393_v18, %v4466_v57 }
 0x152   : > { %v1714_v34 = vadd.f32 %v1713_v22, %v1712_v9  ;;  %v1733_v35 = vadd.f32 %v1732_v23, %v1731_v10  ;;  %v1750_v36 = vadd.f32 %v1574_v24, %v1570_v7  ;;  %v1743_v38 = vadd.f32 %v1573_v26, %v1569_v11  ;;  %v1397_v39 = vpop.f32.mrb[12].mxu1 }
 0x153   : > { %v1727_v21 = vrot.slane %v1726_v28, 1  ;;  %v1721_v40 = vadd.f32 %v1720_v25, %v1719_v14  ;;  %v1737_v42 = vrot.slane %v1736_v30, 4  ;;  %v1757_v43 = vadd.f32 %v1575_v31, %v1571_v15  ;;  %v1399_v46 = vpop.f32.mrb[13].mxu1  ;;  %v1146_v44 = vpop.f32.mrb[14].mxu0 }
 0x154   : > { %v2426_v47 = vsel %vm2425_vm12, %v1714_v34, %v1686_v32  ;;  %v1734_v49 = vrot.slane %v1733_v35, 1  ;;  %v1751_v37 = vrot.slane %v1750_v36, 4  ;;  %v1744_v50 = vrot.slane %v1743_v38, 4  ;;  %v1148_v51 = vpop.f32.mrb[15].mxu0 }
 0x155   : > { %v1728_v52 = vadd.f32 %v1727_v21, %v1726_v28  ;;  %v2439_v54 = vsel %vm2425_vm12, %v1721_v40, %v1693_v58  ;;  %v1738_v55 = vadd.f32 %v1737_v42, %v1736_v30  ;;  %v1758_v56 = vrot.slane %v1757_v43, 4 }
 0x156   : > { %v1735_v59 = vadd.f32 %v1734_v49, %v1733_v35  ;;  %v1752_v60 = vadd.f32 %v1751_v37, %v1750_v36  ;;  %v1745_v61 = vadd.f32 %v1744_v50, %v1743_v38  ;;  %v1576_v62 = vmul.f32 %v1140_v20, %v4441_v29  ;;  %v1403_v63 = vpop.f32.mrb[14].mxu1 }
 0x157   : > { %v2446_v0 = vsel %vm2425_vm12, %v1728_v52, %v1700_v4  ;;  %v1739_v1 = vrot.slane %v1738_v55, 2  ;;  %v1759_v32 = vadd.f32 %v1758_v56, %v1757_v43  ;;  %v1578_v2 = vmul.f32 %v1397_v39, %v4451_v41  ;;  %v1405_v3 = vpop.f32.mrb[15].mxu1  ;;  %v1152_v5 = vpop.f32.mrb[16].mxu0 }
 0x158   : > { %v2453_v6 = vsel %vm2425_vm12, %v1735_v59, %v1707_v8  ;;  %v1753_v7 = vrot.slane %v1752_v60, 2  ;;  %v1746_v58 = vrot.slane %v1745_v61, 2  ;;  %v1577_v9 = vmul.f32 %v1142_v27, %v4445_v33  ;;  %v1154_v10 = vpop.f32.mrb[17].mxu0 }
 0x159   : > { %v1740_v11 = vadd.f32 %v1739_v1, %v1738_v55  ;;  %v1760_v12 = vrot.slane %v1759_v32, 2  ;;  %v1579_v13 = vmul.f32 %v1399_v46, %v4456_v45  ;;  %v1580_v14 = vmul.f32 %v1146_v44, %v4453_v19 }
 0x15a   : > { %v1754_v4 = vadd.f32 %v1753_v7, %v1752_v60  ;;  %v1747_v15 = vadd.f32 %v1746_v58, %v1745_v61  ;;  %v1582_v17 = vmul.f32 %v1403_v63, %v4462_v53  ;;  %v1581_v18 = vmul.f32 %v1148_v51, %v4459_v48  ;;  %v1409_v20 = vpop.f32.mrb[16].mxu1 }
 0x15b   : > { %v1741_v22 = vrot.slane %v1740_v11, 1  ;;  %v1761_v8 = vadd.f32 %v1760_v12, %v1759_v32  ;;  %v1764_v23 = vadd.f32 %v1580_v14, %v1576_v62  ;;  %v1583_v24 = vmul.f32 %v1405_v3, %v4466_v57  ;;  %v1411_v26 = vpop.f32.mrb[17].mxu1  ;;  %v1158_v27 = vpop.f32.mrb[18].mxu0 }
 0x15c   : > { %v1755_v28 = vrot.slane %v1754_v4, 1  ;;  %v1748_v25 = vrot.slane %v1747_v15, 1  ;;  %v1778_v30 = vadd.f32 %v1582_v17, %v1578_v2  ;;  %v1771_v31 = vadd.f32 %v1581_v18, %v1577_v9  ;;  %v1160_v34 = vpop.f32.mrb[19].mxu0 }
 0x15d   : > { %v1742_v35 = vadd.f32 %v1741_v22, %v1740_v11  ;;  %v1762_v36 = vrot.slane %v1761_v8, 1  ;;  %v1765_v38 = vrot.slane %v1764_v23, 4  ;;  %v1785_v39 = vadd.f32 %v1583_v24, %v1579_v13 }
 0x15e   : > { %v1756_v21 = vadd.f32 %v1755_v28, %v1754_v4  ;;  %v1749_v40 = vadd.f32 %v1748_v25, %v1747_v15  ;;  %v1779_v42 = vrot.slane %v1778_v30, 4  ;;  %v1772_v43 = vrot.slane %v1771_v31, 4  ;;  %v1415_v46 = vpop.f32.mrb[18].mxu1 }
 0x15f   : > { %v2428_v44 = vsel %vm2427_vm13, %v1742_v35, %v2426_v47  ;;  %v1763_v49 = vadd.f32 %v1762_v36, %v1761_v8  ;;  %v1766_v37 = vadd.f32 %v1765_v38, %v1764_v23  ;;  %v1786_v50 = vrot.slane %v1785_v39, 4  ;;  %v1417_v51 = vpop.f32.mrb[19].mxu1  ;;  %v1164_v52 = vpop.f32.mrb[20].mxu0 }
 0x160   : > { %v2447_v55 = vsel %vm2427_vm13, %v1756_v21, %v2446_v0  ;;  %v2440_v56 = vsel %vm2427_vm13, %v1749_v40, %v2439_v54  ;;  %v1780_v59 = vadd.f32 %v1779_v42, %v1778_v30  ;;  %v1773_v60 = vadd.f32 %v1772_v43, %v1771_v31  ;;  %v1166_v61 = vpop.f32.mrb[21].mxu0 }
 0x161   : > { %v2454_v62 = vsel %vm2427_vm13, %v1763_v49, %v2453_v6  ;;  %v1767_v63 = vrot.slane %v1766_v37, 2  ;;  %v1787_v1 = vadd.f32 %v1786_v50, %v1785_v39  ;;  %v1584_v32 = vmul.f32 %v1152_v5, %v4441_v29 }
 0x162   : > { %v1781_v2 = vrot.slane %v1780_v59, 2  ;;  %v1774_v47 = vrot.slane %v1773_v60, 2  ;;  %v1586_v3 = vmul.f32 %v1409_v20, %v4451_v41  ;;  %v1585_v7 = vmul.f32 %v1154_v10, %v4445_v33  ;;  %v1421_v58 = vpop.f32.mrb[20].mxu1 }
 0x163   : > { %v1768_v9 = vadd.f32 %v1767_v63, %v1766_v37  ;;  %v1788_v0 = vrot.slane %v1787_v1, 2  ;;  %v1587_v54 = vmul.f32 %v1411_v26, %v4456_v45  ;;  %v1588_v11 = vmul.f32 %v1158_v27, %v4453_v19  ;;  %v1423_v12 = vpop.f32.mrb[21].mxu1  ;;  %v1170_v13 = vpop.f32.mrb[22].mxu0 }
 0x164   : > { %v1782_v6 = vadd.f32 %v1781_v2, %v1780_v59  ;;  %v1775_v14 = vadd.f32 %v1774_v47, %v1773_v60  ;;  %v1590_v4 = vmul.f32 %v1415_v46, %v4462_v53  ;;  %v1589_v5 = vmul.f32 %v1160_v34, %v4459_v48  ;;  %v1172_v15 = vpop.f32.mrb[23].mxu0 }
 0x165   : > { %v1769_v17 = vrot.slane %v1768_v9, 1  ;;  %v1789_v18 = vadd.f32 %v1788_v0, %v1787_v1  ;;  %v1792_v20 = vadd.f32 %v1588_v11, %v1584_v32  ;;  %v1591_v10 = vmul.f32 %v1417_v51, %v4466_v57 }
 0x166   : > { %v1783_v22 = vrot.slane %v1782_v6, 1  ;;  %v1776_v8 = vrot.slane %v1775_v14, 1  ;;  %v1806_v23 = vadd.f32 %v1590_v4, %v1586_v3  ;;  %v1799_v24 = vadd.f32 %v1589_v5, %v1585_v7  ;;  %v1427_v26 = vpop.f32.mrb[22].mxu1 }
 0x167   : > { %v1770_v27 = vadd.f32 %v1769_v17, %v1768_v9  ;;  %v1790_v28 = vrot.slane %v1789_v18, 1  ;;  %v1793_v25 = vrot.slane %v1792_v20, 4  ;;  %v1813_v30 = vadd.f32 %v1591_v10, %v1587_v54  ;;  %v1429_v31 = vpop.f32.mrb[23].mxu1  ;;  %v4511_v35 = vpop.f32.mrb[24].mxu0 }
 0x168   : > { %v1784_v36 = vadd.f32 %v1783_v22, %v1782_v6  ;;  %v1777_v34 = vadd.f32 %v1776_v8, %v1775_v14  ;;  %v1807_v38 = vrot.slane %v1806_v23, 4  ;;  %v1800_v39 = vrot.slane %v1799_v24, 4  ;;  %v4513_v21 = vpop.f32.mrb[25].mxu0 }
 0x169   : > { %v2430_v40 = vsel %vm2429_vm14, %v1770_v27, %v2428_v44  ;;  %v1791_v42 = vadd.f32 %v1790_v28, %v1789_v18  ;;  %v1794_v43 = vadd.f32 %v1793_v25, %v1792_v20  ;;  %v1814_v46 = vrot.slane %v1813_v30, 4 }
 0x16a   : > { %v2448_v49 = vsel %vm2429_vm14, %v1784_v36, %v2447_v55  ;;  %v4518_v37 = vsel %vm2429_vm14, %v1777_v34, %v2440_v56  ;;  %v1808_v50 = vadd.f32 %v1807_v38, %v1806_v23  ;;  %v1801_v51 = vadd.f32 %v1800_v39, %v1799_v24  ;;  %v1433_v59 = vpop.f32.mrb[24].mxu1 }
 0x16b   : > { %v4521_v60 = vsel %vm2429_vm14, %v1791_v42, %v2454_v62  ;;  %v1795_v63 = vrot.slane %v1794_v43, 2  ;;  %v1815_v1 = vadd.f32 %v1814_v46, %v1813_v30  ;;  %v1592_v32 = vmul.f32 %v1164_v52, %v4441_v29  ;;  %v1435_v2 = vpop.f32.mrb[25].mxu1  ;;  %v1182_v44 = vpop.f32.mrb[26].mxu0 }
 0x16c   : > { %5229 = vst [vmem:[#allocation10_spill] sm:$0xff] %v4521_v60  ;;  %v1809_v47 = vrot.slane %v1808_v50, 2  ;;  %v1802_v3 = vrot.slane %v1801_v51, 2  ;;  %v1594_v7 = vmul.f32 %v1421_v58, %v4451_v41  ;;  %v1593_v55 = vmul.f32 %v1166_v61, %v4445_v33  ;;  %v1184_v56 = vpop.f32.mrb[27].mxu0 }
 0x16d   : > { %v1796_v9 = vadd.f32 %v1795_v63, %v1794_v43  ;;  %v1816_v0 = vrot.slane %v1815_v1, 2  ;;  %v1595_v54 = vmul.f32 %v1423_v12, %v4456_v45  ;;  %v1596_v62 = vmul.f32 %v1170_v13, %v4453_v19 }
 0x16e   : > { %v1810_v11 = vadd.f32 %v1809_v47, %v1808_v50  ;;  %v1803_v6 = vadd.f32 %v1802_v3, %v1801_v51  ;;  %v1598_v14 = vmul.f32 %v1427_v26, %v4462_v53  ;;  %v1597_v52 = vmul.f32 %v1172_v15, %v4459_v48  ;;  %v1439_v4 = vpop.f32.mrb[26].mxu1 }
 0x16f   : > { %v1797_v5 = vrot.slane %v1796_v9, 1  ;;  %v1817_v17 = vadd.f32 %v1816_v0, %v1815_v1  ;;  %v1820_v18 = vadd.f32 %v1596_v62, %v1592_v32  ;;  %v1599_v58 = vmul.f32 %v1429_v31, %v4466_v57  ;;  %v1441_v61 = vpop.f32.mrb[27].mxu1  ;;  %v4531_v20 = vpop.f32.mrb[28].mxu0 }
 0x170   : > { %v1811_v10 = vrot.slane %v1810_v11, 1  ;;  %v1804_v22 = vrot.slane %v1803_v6, 1  ;;  %v1834_v12 = vadd.f32 %v1598_v14, %v1594_v7  ;;  %v1827_v8 = vadd.f32 %v1597_v52, %v1593_v55  ;;  %v4533_v13 = vpop.f32.mrb[29].mxu0 }
 0x171   : > { %v1798_v23 = vadd.f32 %v1797_v5, %v1796_v9  ;;  %v1818_v24 = vrot.slane %v1817_v17, 1  ;;  %v1821_v26 = vrot.slane %v1820_v18, 4  ;;  %v1841_v27 = vadd.f32 %v1599_v58, %v1595_v54 }
 0x172   : > { %v1812_v15 = vadd.f32 %v1811_v10, %v1810_v11  ;;  %v4535_v28 = vadd.f32 %v1804_v22, %v1803_v6  ;;  %v1835_v25 = vrot.slane %v1834_v12, 4  ;;  %v1828_v30 = vrot.slane %v1827_v8, 4  ;;  %v1445_v36 = vpop.f32.mrb[28].mxu1 }
 0x173   : > { %v4538_v31 = vsel %vm2431_vm15, %v1798_v23, %v2430_v40  ;;  %v4540_v34 = vadd.f32 %v1818_v24, %v1817_v17  ;;  %v1822_v38 = vadd.f32 %v1821_v26, %v1820_v18  ;;  %v1842_v39 = vrot.slane %v1841_v27, 4  ;;  %v1447_v42 = vpop.f32.mrb[29].mxu1  ;;  %v1194_v43 = vpop.f32.mrb[30].mxu0 }
 0x174   : > { %5230 = vst [vmem:[#allocation11_spill] sm:$0xff] %v4538_v31  ;;  %v4543_v46 = vsel %vm2431_vm15, %v1812_v15, %v2448_v49  ;;  %v1836_v50 = vadd.f32 %v1835_v25, %v1834_v12  ;;  %v1829_v51 = vadd.f32 %v1828_v30, %v1827_v8  ;;  %v1600_v63 = vmul.f32 %v4511_v35, %v4441_v29  ;;  %v1196_v1 = vpop.f32.mrb[31].mxu0 }
 0x175   : > { %5231 = vst [vmem:[#allocation12_spill] sm:$0xff] %v4540_v34  ;;  %5232 = vst [vmem:[#allocation13_spill] sm:$0xff] %v4543_v46  ;;  %v1823_v32 = vrot.slane %v1822_v38, 2  ;;  %v1843_v47 = vadd.f32 %v1842_v39, %v1841_v27  ;;  %v1602_v40 = vmul.f32 %v1433_v59, %v4451_v41  ;;  %v1601_v3 = vmul.f32 %v4513_v21, %v4445_v33 }
 0x176   : > { %v1837_v7 = vrot.slane %v1836_v50, 2  ;;  %v1830_v55 = vrot.slane %v1829_v51, 2  ;;  %v1603_v9 = vmul.f32 %v1435_v2, %v4456_v45  ;;  %v1604_v49 = vmul.f32 %v1182_v44, %v4453_v19  ;;  %v1451_v0 = vpop.f32.mrb[30].mxu1 }
 0x177   : > { %v1824_v54 = vadd.f32 %v1823_v32, %v1822_v38  ;;  %v1844_v62 = vrot.slane %v1843_v47, 2  ;;  %v1606_v11 = vmul.f32 %v1439_v4, %v4462_v53  ;;  %v1605_v35 = vmul.f32 %v1184_v56, %v4459_v48  ;;  %v1453_v6 = vpop.f32.mrb[31].mxu1  ;;  %v4554_v14 = vpop.f32.mrb[32].mxu0 }
 0x178   : > { %v1838_v59 = vadd.f32 %v1837_v7, %v1836_v50  ;;  %v1831_v52 = vadd.f32 %v1830_v55, %v1829_v51  ;;  %v1848_v5 = vadd.f32 %v1604_v49, %v1600_v63  ;;  %v1607_v21 = vmul.f32 %v1441_v61, %v4466_v57  ;;  %v4557_v17 = vpop.f32.mrb[33].mxu0 }
 0x179   : > { %v1825_v2 = vrot.slane %v1824_v54, 1  ;;  %v1845_v18 = vadd.f32 %v1844_v62, %v1843_v47  ;;  %v1862_v44 = vadd.f32 %v1606_v11, %v1602_v40  ;;  %v1855_v58 = vadd.f32 %v1605_v35, %v1601_v3 }
 0x17a   : > { %v1839_v10 = vrot.slane %v1838_v59, 1  ;;  %v1832_v22 = vrot.slane %v1831_v52, 1  ;;  %v1849_v12 = vrot.slane %v1848_v5, 4  ;;  %v1869_v4 = vadd.f32 %v1607_v21, %v1603_v9  ;;  %v4559_v8 = vpop.f32.mrb[32].mxu1 }
 0x17b   : > { %v4561_v56 = vadd.f32 %v1825_v2, %v1824_v54  ;;  %v1846_v23 = vrot.slane %v1845_v18, 1  ;;  %v1863_v24 = vrot.slane %v1862_v44, 4  ;;  %v1856_v26 = vrot.slane %v1855_v58, 4  ;;  %v4563_v27 = vpop.f32.mrb[33].mxu1  ;;  %v4565_v61 = vpop.f32.mrb[34].mxu0 }
 0x17c   : > { %v4567_v15 = vadd.f32 %v1839_v10, %v1838_v59  ;;  %v4569_v25 = vadd.f32 %v1832_v22, %v1831_v52  ;;  %v1850_v30 = vadd.f32 %v1849_v12, %v1848_v5  ;;  %v1870_v38 = vrot.slane %v1869_v4, 4  ;;  %v4571_v39 = vpop.f32.mrb[35].mxu0 }
 0x17d   : > { %5233 = vst [vmem:[#allocation14_spill] sm:$0xff] %v4561_v56  ;;  %v4573_v50 = vadd.f32 %v1846_v23, %v1845_v18  ;;  %v1864_v51 = vadd.f32 %v1863_v24, %v1862_v44  ;;  %v1857_v63 = vadd.f32 %v1856_v26, %v1855_v58  ;;  %v1608_v32 = vmul.f32 %v4531_v20, %v4441_v29 }
 0x17e   : > { %5234 = vst [vmem:[#allocation15_spill] sm:$0xff] %v4567_v15  ;;  %v1851_v47 = vrot.slane %v1850_v30, 2  ;;  %v1871_v40 = vadd.f32 %v1870_v38, %v1869_v4  ;;  %v1610_v3 = vmul.f32 %v1445_v36, %v4451_v41  ;;  %v1609_v7 = vmul.f32 %v4533_v13, %v4445_v33  ;;  %v1463_v55 = vpop.f32.mrb[34].mxu1 }
 0x17f   : > { %5235 = vst [vmem:[#allocation16_spill] sm:$0xff] %v4573_v50  ;;  %v1865_v9 = vrot.slane %v1864_v51, 2  ;;  %v1858_v49 = vrot.slane %v1857_v63, 2  ;;  %v1611_v54 = vmul.f32 %v1447_v42, %v4456_v45  ;;  %v1612_v62 = vmul.f32 %v1194_v43, %v4453_v19  ;;  %v1465_v11 = vpop.f32.mrb[35].mxu1  ;;  %v4582_v35 = vpop.f32.mrb[36].mxu0 }
 0x180   : > { %v1852_v59 = vadd.f32 %v1851_v47, %v1850_v30  ;;  %v1872_v52 = vrot.slane %v1871_v40, 2  ;;  %v1614_v20 = vmul.f32 %v1451_v0, %v4462_v53  ;;  %v1613_v5 = vmul.f32 %v1196_v1, %v4459_v48  ;;  %v4586_v36 = vpop.f32.mrb[37].mxu0 }
 0x181   : > { %v1866_v21 = vadd.f32 %v1865_v9, %v1864_v51  ;;  %v1859_v13 = vadd.f32 %v1858_v49, %v1857_v63  ;;  %v1876_v2 = vadd.f32 %v1612_v62, %v1608_v32  ;;  %v1615_v18 = vmul.f32 %v1453_v6, %v4466_v57 }
 0x182   : > { %v1853_v44 = vrot.slane %v1852_v59, 1  ;;  %v1873_v42 = vadd.f32 %v1872_v52, %v1871_v40  ;;  %v1890_v58 = vadd.f32 %v1614_v20, %v1610_v3  ;;  %v1883_v43 = vadd.f32 %v1613_v5, %v1609_v7  ;;  %v4589_v10 = vpop.f32.mrb[36].mxu1 }
 0x183   : > { %v1867_v22 = vrot.slane %v1866_v21, 1  ;;  %v1860_v12 = vrot.slane %v1859_v13, 1  ;;  %v1877_v4 = vrot.slane %v1876_v2, 4  ;;  %v1897_v23 = vadd.f32 %v1615_v18, %v1611_v54  ;;  %v4591_v0 = vpop.f32.mrb[37].mxu1  ;;  %v4593_v1 = vpop.f32.mrb[38].mxu0 }
 0x184   : > { %v4595_v24 = vadd.f32 %v1853_v44, %v1852_v59  ;;  %v1874_v26 = vrot.slane %v1873_v42, 1  ;;  %v1891_v30 = vrot.slane %v1890_v58, 4  ;;  %v1884_v38 = vrot.slane %v1883_v43, 4  ;;  %v4597_v6 = vpop.f32.mrb[39].mxu0 }
 0x185   : > { %v4599_v51 = vadd.f32 %v1867_v22, %v1866_v21  ;;  %v4601_v63 = vadd.f32 %v1860_v12, %v1859_v13  ;;  %v1878_v32 = vadd.f32 %v1877_v4, %v1876_v2  ;;  %v1898_v47 = vrot.slane %v1897_v23, 4 }
 0x186   : > { %5236 = vst [vmem:[#allocation17_spill] sm:$0xff] %v4595_v24  ;;  %v4603_v40 = vadd.f32 %v1874_v26, %v1873_v42  ;;  %v1892_v3 = vadd.f32 %v1891_v30, %v1890_v58  ;;  %v1885_v7 = vadd.f32 %v1884_v38, %v1883_v43  ;;  %v1616_v9 = vmul.f32 %v4554_v14, %v4441_v29  ;;  %v1475_v49 = vpop.f32.mrb[38].mxu1 }
 0x187   : > { %5237 = vst [vmem:[#allocation18_spill] sm:$0xff] %v4599_v51  ;;  %5238 = vst [vmem:[#allocation19_spill] sm:$0xff] %v4601_v63  ;;  %v1879_v54 = vrot.slane %v1878_v32, 2  ;;  %v1899_v62 = vadd.f32 %v1898_v47, %v1897_v23  ;;  %v1618_v59 = vmul.f32 %v4559_v8, %v4451_v41  ;;  %v1617_v52 = vmul.f32 %v4557_v17, %v4445_v33  ;;  %v1477_v20 = vpop.f32.mrb[39].mxu1  ;;  %v4611_v5 = vpop.f32.mrb[40].mxu0 }
 0x188   : > { %5239 = vst [vmem:[#allocation20_spill] sm:$0xff] %v4603_v40  ;;  %v1893_v21 = vrot.slane %v1892_v3, 2  ;;  %v1886_v13 = vrot.slane %v1885_v7, 2  ;;  %v1619_v2 = vmul.f32 %v4563_v27, %v4456_v45  ;;  %v1620_v14 = vmul.f32 %v4565_v61, %v4453_v19  ;;  %v4617_v18 = vpop.f32.mrb[41].mxu0 }
 0x189   : > { %v1880_v44 = vadd.f32 %v1879_v54, %v1878_v32  ;;  %v1900_v42 = vrot.slane %v1899_v62, 2  ;;  %v1622_v8 = vmul.f32 %v1463_v55, %v4462_v53  ;;  %v1621_v17 = vmul.f32 %v4571_v39, %v4459_v48 }
 0x18a   : > { %v1894_v58 = vadd.f32 %v1893_v21, %v1892_v3  ;;  %v1887_v43 = vadd.f32 %v1886_v13, %v1885_v7  ;;  %v1904_v22 = vadd.f32 %v1620_v14, %v1616_v9  ;;  %v1623_v12 = vmul.f32 %v1465_v11, %v4466_v57  ;;  %v4623_v4 = vpop.f32.mrb[40].mxu1 }
 0x18b   : > { %v1881_v27 = vrot.slane %v1880_v44, 1  ;;  %v1901_v23 = vadd.f32 %v1900_v42, %v1899_v62  ;;  %v1918_v26 = vadd.f32 %v1622_v8, %v1618_v59  ;;  %v1911_v61 = vadd.f32 %v1621_v17, %v1617_v52  ;;  %v4625_v30 = vpop.f32.mrb[41].mxu1  ;;  %v4627_v38 = vpop.f32.mrb[42].mxu0 }
 0x18c   : > { %v1895_v32 = vrot.slane %v1894_v58, 1  ;;  %v1888_v55 = vrot.slane %v1887_v43, 1  ;;  %v1905_v47 = vrot.slane %v1904_v22, 4  ;;  %v1925_v54 = vadd.f32 %v1623_v12, %v1619_v2  ;;  %v4629_v39 = vpop.f32.mrb[43].mxu0 }
 0x18d   : > { %v4631_v3 = vadd.f32 %v1881_v27, %v1880_v44  ;;  %v1902_v7 = vrot.slane %v1901_v23, 1  ;;  %v1919_v11 = vrot.slane %v1918_v26, 4  ;;  %v1912_v9 = vrot.slane %v1911_v61, 4 }
 0x18e   : > { %v4633_v21 = vadd.f32 %v1895_v32, %v1894_v58  ;;  %v4635_v62 = vadd.f32 %v1888_v55, %v1887_v43  ;;  %v1906_v59 = vadd.f32 %v1905_v47, %v1904_v22  ;;  %v1926_v52 = vrot.slane %v1925_v54, 4  ;;  %v4637_v13 = vpop.f32.mrb[42].mxu1 }
 0x18f   : > { %5240 = vst [vmem:[#allocation21_spill] sm:$0xff] %v4631_v3  ;;  %v4639_v14 = vadd.f32 %v1902_v7, %v1901_v23  ;;  %v1920_v42 = vadd.f32 %v1919_v11, %v1918_v26  ;;  %v1913_v8 = vadd.f32 %v1912_v9, %v1911_v61  ;;  %v1624_v2 = vmul.f32 %v4582_v35, %v4441_v29  ;;  %v4643_v44 = vpop.f32.mrb[43].mxu1  ;;  %v4645_v17 = vpop.f32.mrb[44].mxu0 }
 0x190   : > { %5241 = vst [vmem:[#allocation22_spill] sm:$0xff] %v4633_v21  ;;  %5242 = vst [vmem:[#allocation23_spill] sm:$0xff] %v4635_v62  ;;  %v1907_v12 = vrot.slane %v1906_v59, 2  ;;  %v1927_v58 = vadd.f32 %v1926_v52, %v1925_v54  ;;  %v1626_v43 = vmul.f32 %v4589_v10, %v4451_v41  ;;  %v1625_v22 = vmul.f32 %v4586_v36, %v4445_v33  ;;  %v4651_v27 = vpop.f32.mrb[45].mxu0 }
 0x191   : > { %5243 = vst [vmem:[#allocation24_spill] sm:$0xff] %v4639_v14  ;;  %v1921_v23 = vrot.slane %v1920_v42, 2  ;;  %v1914_v26 = vrot.slane %v1913_v8, 2  ;;  %v1627_v61 = vmul.f32 %v4591_v0, %v4456_v45  ;;  %v1628_v35 = vmul.f32 %v4593_v1, %v4453_v19 }
 0x192   : > { %v1908_v32 = vadd.f32 %v1907_v12, %v1906_v59  ;;  %v1928_v55 = vrot.slane %v1927_v58, 2  ;;  %v1630_v47 = vmul.f32 %v1475_v49, %v4462_v53  ;;  %v1629_v10 = vmul.f32 %v4597_v6, %v4459_v48  ;;  %v4660_v54 = vpop.f32.mrb[44].mxu1 }
 0x193   : > { %v1922_v36 = vadd.f32 %v1921_v23, %v1920_v42  ;;  %v1915_v7 = vadd.f32 %v1914_v26, %v1913_v8  ;;  %v1932_v11 = vadd.f32 %v1628_v35, %v1624_v2  ;;  %v1631_v9 = vmul.f32 %v1477_v20, %v4466_v57  ;;  %v4663_v52 = vpop.f32.mrb[45].mxu1  ;;  %v4665_v0 = vpop.f32.mrb[46].mxu0 }
 0x194   : > { %v1909_v16 = vrot.slane %v1908_v32, 1  ;;  %v1929_v1 = vadd.f32 %v1928_v55, %v1927_v58  ;;  %v1946_v59 = vadd.f32 %v1630_v47, %v1626_v43  ;;  %v1939_v12 = vadd.f32 %v1629_v10, %v1625_v22  ;;  %v4667_v21 = vpop.f32.mrb[47].mxu0 }
 0x195   : > { %v1923_v49 = vrot.slane %v1922_v36, 1  ;;  %v1916_v51 = vrot.slane %v1915_v7, 1  ;;  %v1933_v6 = vrot.slane %v1932_v11, 4  ;;  %v1953_v15 = vadd.f32 %v1631_v9, %v1627_v61 }
 0x196   : > { %v1910_v46 = vadd.f32 %v1909_v16, %v1908_v32  ;;  %v1930_v42 = vrot.slane %v1929_v1, 1  ;;  %v1947_v8 = vrot.slane %v1946_v59, 4  ;;  %v1940_v2 = vrot.slane %v1939_v12, 4  ;;  %v4669_v23 = vpop.f32.mrb[46].mxu1 }
 0x197   : > { %v1924_v20 = vadd.f32 %v1923_v49, %v1922_v36  ;;  %v1917_v26 = vadd.f32 %v1916_v51, %v1915_v7  ;;  %v1934_v35 = vadd.f32 %v1933_v6, %v1932_v11  ;;  %v1954_v3 = vrot.slane %v1953_v15, 4  ;;  %v4671_v24 = vpop.f32.mrb[47].mxu1  ;;  %v4673_v58 = vpop.f32.mrb[48].mxu0 }
 0x198   : > { %v1931_v43 = vadd.f32 %v1930_v42, %v1929_v1  ;;  %v1948_v22 = vadd.f32 %v1947_v8, %v1946_v59  ;;  %v1941_v55 = vadd.f32 %v1940_v2, %v1939_v12  ;;  %v1632_v61 = vmul.f32 %v4611_v5, %v4441_v29  ;;  %v4677_v16 = vpop.f32.mrb[49].mxu0 }
 0x199   : > { %v1935_v32 = vrot.slane %v1934_v35, 2  ;;  %v1955_v47 = vadd.f32 %v1954_v3, %v1953_v15  ;;  %v1634_v10 = vmul.f32 %v4623_v4, %v4451_v41  ;;  %v1633_v51 = vmul.f32 %v4617_v18, %v4445_v33 }
 0x19a   : > { %v1949_v36 = vrot.slane %v1948_v22, 2  ;;  %v1942_v7 = vrot.slane %v1941_v55, 2  ;;  %v1635_v11 = vmul.f32 %v4625_v30, %v4456_v45  ;;  %v1636_v9 = vmul.f32 %v4627_v38, %v4453_v19  ;;  %v4687_v1 = vpop.f32.mrb[48].mxu1 }
 0x19b   : > { %v1936_v5 = vadd.f32 %v1935_v32, %v1934_v35  ;;  %v1956_v59 = vrot.slane %v1955_v47, 2  ;;  %v1638_v15 = vmul.f32 %v4637_v13, %v4462_v53  ;;  %v1637_v4 = vmul.f32 %v4629_v39, %v4459_v48  ;;  %v4693_v3 = vpop.f32.mrb[49].mxu1  ;;  %v4695_v18 = vpop.f32.mrb[50].mxu0 }
 0x19c   : > { %v1950_v12 = vadd.f32 %v1949_v36, %v1948_v22  ;;  %v1943_v49 = vadd.f32 %v1942_v7, %v1941_v55  ;;  %v1960_v30 = vadd.f32 %v1636_v9, %v1632_v61  ;;  %v1639_v38 = vmul.f32 %v4643_v44, %v4466_v57  ;;  %v4699_v6 = vpop.f32.mrb[51].mxu0 }
 0x19d   : > { %v1937_v42 = vrot.slane %v1936_v5, 1  ;;  %v1957_v8 = vadd.f32 %v1956_v59, %v1955_v47  ;;  %v1974_v2 = vadd.f32 %v1638_v15, %v1634_v10  ;;  %v1967_v35 = vadd.f32 %v1637_v4, %v1633_v51 }
 0x19e   : > { %v1951_v13 = vrot.slane %v1950_v12, 1  ;;  %v1944_v32 = vrot.slane %v1943_v49, 1  ;;  %v1961_v56 = vrot.slane %v1960_v30, 4  ;;  %v1981_v39 = vadd.f32 %v1639_v38, %v1635_v11  ;;  %v4701_v31 = vpop.f32.mrb[50].mxu1 }
 0x19f   : > { %v1938_v14 = vadd.f32 %v1937_v42, %v1936_v5  ;;  %v1958_v40 = vrot.slane %v1957_v8, 1  ;;  %v1975_v22 = vrot.slane %v1974_v2, 4  ;;  %v1968_v55 = vrot.slane %v1967_v35, 4  ;;  %v4703_v61 = vpop.f32.mrb[51].mxu1  ;;  %v4705_v36 = vpop.f32.mrb[52].mxu0 }
 0x1a0   : > { %v1952_v44 = vadd.f32 %v1951_v13, %v1950_v12  ;;  %v1945_v7 = vadd.f32 %v1944_v32, %v1943_v49  ;;  %v1962_v9 = vadd.f32 %v1961_v56, %v1960_v30  ;;  %v1982_v47 = vrot.slane %v1981_v39, 4  ;;  %v4707_v10 = vpop.f32.mrb[53].mxu0 }
 0x1a1   : > { %v2460_v51 = vsel %vm2425_vm12, %v1938_v14, %v1910_v46  ;;  %v1959_v59 = vadd.f32 %v1958_v40, %v1957_v8  ;;  %v1976_v11 = vadd.f32 %v1975_v22, %v1974_v2  ;;  %v1969_v15 = vadd.f32 %v1968_v55, %v1967_v35 }
 0x1a2   : > { %v2474_v5 = vsel %vm2425_vm12, %v1952_v44, %v1924_v20  ;;  %v2467_v4 = vsel %vm2425_vm12, %v1945_v7, %v1917_v26  ;;  %v1963_v38 = vrot.slane %v1962_v9, 2  ;;  %v1983_v42 = vadd.f32 %v1982_v47, %v1981_v39  ;;  %v4712_v50 = vpop.f32.mrb[52].mxu1 }
 0x1a3   : > { %v2481_v12 = vsel %vm2425_vm12, %v1959_v59, %v1931_v43  ;;  %v1977_v49 = vrot.slane %v1976_v11, 2  ;;  %v1970_v56 = vrot.slane %v1969_v15, 2  ;;  %v1640_v30 = vmul.f32 %v4645_v17, %v4441_v29  ;;  %v4717_v13 = vpop.f32.mrb[53].mxu1  ;;  %v4719_v46 = vpop.f32.mrb[54].mxu0 }
 0x1a4   : > { %v1964_v40 = vadd.f32 %v1963_v38, %v1962_v9  ;;  %v1984_v14 = vrot.slane %v1983_v42, 2  ;;  %v1642_v20 = vmul.f32 %v4660_v54, %v4451_v41  ;;  %v1641_v26 = vmul.f32 %v4651_v27, %v4445_v33  ;;  %v4725_v8 = vpop.f32.mrb[55].mxu0 }
 0x1a5   : > { %v1978_v43 = vadd.f32 %v1977_v49, %v1976_v11  ;;  %v1971_v2 = vadd.f32 %v1970_v56, %v1969_v15  ;;  %v1643_v35 = vmul.f32 %v4663_v52, %v4456_v45  ;;  %v1644_v17 = vmul.f32 %v4665_v0, %v4453_v19 }
 0x1a6   : > { %v1965_v32 = vrot.slane %v1964_v40, 1  ;;  %v1985_v39 = vadd.f32 %v1984_v14, %v1983_v42  ;;  %v1646_v22 = vmul.f32 %v4669_v23, %v4462_v53  ;;  %v1645_v54 = vmul.f32 %v4667_v21, %v4459_v48  ;;  %v4735_v55 = vpop.f32.mrb[54].mxu1 }
 0x1a7   : > { %v1979_v27 = vrot.slane %v1978_v43, 1  ;;  %v1972_v44 = vrot.slane %v1971_v2, 1  ;;  %v1988_v7 = vadd.f32 %v1644_v17, %v1640_v30  ;;  %v1647_v9 = vmul.f32 %v4671_v24, %v4466_v57  ;;  %v4739_v52 = vpop.f32.mrb[55].mxu1  ;;  %v4741_v47 = vpop.f32.mrb[56].mxu0 }
 0x1a8   : > { %v1966_v0 = vadd.f32 %v1965_v32, %v1964_v40  ;;  %v1986_v59 = vrot.slane %v1985_v39, 1  ;;  %v2002_v11 = vadd.f32 %v1646_v22, %v1642_v20  ;;  %v1995_v15 = vadd.f32 %v1645_v54, %v1641_v26  ;;  %v4743_v23 = vpop.f32.mrb[57].mxu0 }
 0x1a9   : > { %v1980_v38 = vadd.f32 %v1979_v27, %v1978_v43  ;;  %v1973_v21 = vadd.f32 %v1972_v44, %v1971_v2  ;;  %v1989_v42 = vrot.slane %v1988_v7, 4  ;;  %v2009_v49 = vadd.f32 %v1647_v9, %v1643_v35 }
 0x1aa   : > { %v2461_v56 = vsel %vm2427_vm13, %v1966_v0, %v2460_v51  ;;  %v1987_v30 = vadd.f32 %v1986_v59, %v1985_v39  ;;  %v2003_v14 = vrot.slane %v2002_v11, 4  ;;  %v1996_v17 = vrot.slane %v1995_v15, 4  ;;  %v4746_v24 = vpop.f32.mrb[56].mxu1 }
 0x1ab   : > { %v2475_v34 = vsel %vm2427_vm13, %v1980_v38, %v2474_v5  ;;  %v2468_v40 = vsel %vm2427_vm13, %v1973_v21, %v2467_v4  ;;  %v1990_v32 = vadd.f32 %v1989_v42, %v1988_v7  ;;  %v2010_v20 = vrot.slane %v2009_v49, 4  ;;  %v4750_v26 = vpop.f32.mrb[57].mxu1  ;;  %v4752_v22 = vpop.f32.mrb[58].mxu0 }
 0x1ac   : > { %v2482_v43 = vsel %vm2427_vm13, %v1987_v30, %v2481_v12  ;;  %v2004_v2 = vadd.f32 %v2003_v14, %v2002_v11  ;;  %v1997_v35 = vadd.f32 %v1996_v17, %v1995_v15  ;;  %v1648_v51 = vmul.f32 %v4673_v58, %v4441_v29  ;;  %v4757_v39 = vpop.f32.mrb[59].mxu0 }
 0x1ad   : > { %v1991_v54 = vrot.slane %v1990_v32, 2  ;;  %v2011_v27 = vadd.f32 %v2010_v20, %v2009_v49  ;;  %v1650_v5 = vmul.f32 %v4687_v1, %v4451_v41  ;;  %v1649_v4 = vmul.f32 %v4677_v16, %v4445_v33 }
 0x1ae   : > { %v2005_v44 = vrot.slane %v2004_v2, 2  ;;  %v1998_v7 = vrot.slane %v1997_v35, 2  ;;  %v1651_v12 = vmul.f32 %v4693_v3, %v4456_v45  ;;  %v1652_v9 = vmul.f32 %v4695_v18, %v4453_v19  ;;  %v4767_v0 = vpop.f32.mrb[58].mxu1 }
 0x1af   : > { %v1992_v58 = vadd.f32 %v1991_v54, %v1990_v32  ;;  %v2012_v59 = vrot.slane %v2011_v27, 2  ;;  %v1654_v11 = vmul.f32 %v4701_v31, %v4462_v53  ;;  %v1653_v1 = vmul.f32 %v4699_v6, %v4459_v48  ;;  %v4773_v15 = vpop.f32.mrb[59].mxu1  ;;  %v4775_v16 = vpop.f32.mrb[60].mxu0 }
 0x1b0   : > { %v2006_v38 = vadd.f32 %v2005_v44, %v2004_v2  ;;  %v1999_v21 = vadd.f32 %v1998_v7, %v1997_v35  ;;  %v2016_v3 = vadd.f32 %v1652_v9, %v1648_v51  ;;  %v1655_v18 = vmul.f32 %v4703_v61, %v4466_v57  ;;  %v4779_v42 = vpop.f32.mrb[61].mxu0 }
 0x1b1   : > { %v1993_v49 = vrot.slane %v1992_v58, 1  ;;  %v2013_v30 = vadd.f32 %v2012_v59, %v2011_v27  ;;  %v2030_v14 = vadd.f32 %v1654_v11, %v1650_v5  ;;  %v2023_v17 = vadd.f32 %v1653_v1, %v1649_v4 }
 0x1b2   : > { %v2007_v31 = vrot.slane %v2006_v38, 1  ;;  %v2000_v32 = vrot.slane %v1999_v21, 1  ;;  %v2017_v20 = vrot.slane %v2016_v3, 4  ;;  %v2037_v6 = vadd.f32 %v1655_v18, %v1651_v12  ;;  %v4781_v54 = vpop.f32.mrb[60].mxu1 }
 0x1b3   : > { %v1994_v60 = vadd.f32 %v1993_v49, %v1992_v58  ;;  %v2014_v62 = vrot.slane %v2013_v30, 1  ;;  %v2031_v2 = vrot.slane %v2030_v14, 4  ;;  %v2024_v35 = vrot.slane %v2023_v17, 4  ;;  %v4783_v51 = vpop.f32.mrb[61].mxu1  ;;  %v4785_v44 = vpop.f32.mrb[62].mxu0 }
 0x1b4   : > { %v2008_v61 = vadd.f32 %v2007_v31, %v2006_v38  ;;  %v2001_v7 = vadd.f32 %v2000_v32, %v1999_v21  ;;  %v2018_v9 = vadd.f32 %v2017_v20, %v2016_v3  ;;  %v2038_v27 = vrot.slane %v2037_v6, 4  ;;  %v4787_v5 = vpop.f32.mrb[63].mxu0 }
 0x1b5   : > { %v2462_v4 = vsel %vm2429_vm14, %v1994_v60, %v2461_v56  ;;  %v2015_v59 = vadd.f32 %v2014_v62, %v2013_v30  ;;  %v2032_v12 = vadd.f32 %v2031_v2, %v2030_v14  ;;  %v2025_v11 = vadd.f32 %v2024_v35, %v2023_v17 }
 0x1b6   : > { %v2476_v58 = vsel %vm2429_vm14, %v2008_v61, %v2475_v34  ;;  %v4792_v1 = vsel %vm2429_vm14, %v2001_v7, %v2468_v40  ;;  %v2019_v18 = vrot.slane %v2018_v9, 2  ;;  %v2039_v49 = vadd.f32 %v2038_v27, %v2037_v6  ;;  %v4794_v63 = vpop.f32.mrb[62].mxu1 }
 0x1b7   : > { %v4797_v38 = vsel %vm2429_vm14, %v2015_v59, %v2482_v43  ;;  %v2033_v21 = vrot.slane %v2032_v12, 2  ;;  %v2026_v3 = vrot.slane %v2025_v11, 2  ;;  %v1656_v60 = vmul.f32 %v4705_v36, %v4441_v29  ;;  %v4801_v62 = vpop.f32.mrb[63].mxu1 }
 0x1b8   : > { %v2020_v56 = vadd.f32 %v2019_v18, %v2018_v9  ;;  %v2040_v30 = vrot.slane %v2039_v49, 2  ;;  %v1658_v34 = vmul.f32 %v4712_v50, %v4451_v41  ;;  %v1657_v40 = vmul.f32 %v4707_v10, %v4445_v33 }
 0x1b9   : > { %v2034_v14 = vadd.f32 %v2033_v21, %v2032_v12  ;;  %v2027_v17 = vadd.f32 %v2026_v3, %v2025_v11  ;;  %v1659_v43 = vmul.f32 %v4717_v13, %v4456_v45  ;;  %v1660_v31 = vmul.f32 %v4719_v46, %v4453_v19 }
 0x1ba   : > { %v2021_v32 = vrot.slane %v2020_v56, 1  ;;  %v2041_v36 = vadd.f32 %v2040_v30, %v2039_v49  ;;  %v1662_v20 = vmul.f32 %v4735_v55, %v4462_v53  ;;  %v1661_v6 = vmul.f32 %v4725_v8, %v4459_v48 }
 0x1bb   : > { %v2035_v50 = vrot.slane %v2034_v14, 1  ;;  %v2028_v2 = vrot.slane %v2027_v17, 1  ;;  %v2044_v35 = vadd.f32 %v1660_v31, %v1656_v60  ;;  %v1663_v10 = vmul.f32 %v4739_v52, %v4466_v57 }
 0x1bc   : > { %v2022_v61 = vadd.f32 %v2021_v32, %v2020_v56  ;;  %v2042_v7 = vrot.slane %v2041_v36, 1  ;;  %v2058_v13 = vadd.f32 %v1662_v20, %v1658_v34  ;;  %v2051_v9 = vadd.f32 %v1661_v6, %v1657_v40 }
 0x1bd   : > { %v2036_v27 = vadd.f32 %v2035_v50, %v2034_v14  ;;  %v4817_v46 = vadd.f32 %v2028_v2, %v2027_v17  ;;  %v2045_v59 = vrot.slane %v2044_v35, 4  ;;  %v2065_v12 = vadd.f32 %v1663_v10, %v1659_v43 }
 0x1be   : > { %v4820_v55 = vsel %vm2431_vm15, %v2022_v61, %v2462_v4  ;;  %v4822_v11 = vadd.f32 %v2042_v7, %v2041_v36  ;;  %v2059_v8 = vrot.slane %v2058_v13, 4  ;;  %v2052_v18 = vrot.slane %v2051_v9, 4 }
 0x1bf   : > { %v4825_v49 = vsel %vm2431_vm15, %v2036_v27, %v2476_v58  ;;  %v2046_v52 = vadd.f32 %v2045_v59, %v2044_v35  ;;  %v2066_v21 = vrot.slane %v2065_v12, 4  ;;  %v1664_v3 = vmul.f32 %v4741_v47, %v4441_v29 }
 0x1c0   : > { %v2060_v60 = vadd.f32 %v2059_v8, %v2058_v13  ;;  %v2053_v56 = vadd.f32 %v2052_v18, %v2051_v9  ;;  %v1666_v30 = vmul.f32 %v4746_v24, %v4451_v41  ;;  %v1665_v4 = vmul.f32 %v4743_v23, %v4445_v33 }
 0x1c1   : > { %v2047_v34 = vrot.slane %v2046_v52, 2  ;;  %v2067_v40 = vadd.f32 %v2066_v21, %v2065_v12  ;;  %v1667_v14 = vmul.f32 %v4750_v26, %v4456_v45  ;;  %v1668_v58 = vmul.f32 %v4752_v22, %v4453_v19 }
 0x1c2   : > { %v2061_v17 = vrot.slane %v2060_v60, 2  ;;  %v2054_v43 = vrot.slane %v2053_v56, 2  ;;  %v1670_v47 = vmul.f32 %v4767_v0, %v4462_v53  ;;  %v1669_v31 = vmul.f32 %v4757_v39, %v4459_v48 }
 0x1c3   : > { %v2048_v24 = vadd.f32 %v2047_v34, %v2046_v52  ;;  %v2068_v32 = vrot.slane %v2067_v40, 2  ;;  %v2072_v36 = vadd.f32 %v1668_v58, %v1664_v3  ;;  %v1671_v23 = vmul.f32 %v4773_v15, %v4466_v57 }
 0x1c4   : > { %v2062_v20 = vadd.f32 %v2061_v17, %v2060_v60  ;;  %v2055_v6 = vadd.f32 %v2054_v43, %v2053_v56  ;;  %v2086_v26 = vadd.f32 %v1670_v47, %v1666_v30  ;;  %v2079_v50 = vadd.f32 %v1669_v31, %v1665_v4 }
 0x1c5   : > { %v2049_v2 = vrot.slane %v2048_v24, 1  ;;  %v2069_v22 = vadd.f32 %v2068_v32, %v2067_v40  ;;  %v2073_v35 = vrot.slane %v2072_v36, 4  ;;  %v2093_v10 = vadd.f32 %v1671_v23, %v1667_v14 }
 0x1c6   : > { %v2063_v61 = vrot.slane %v2062_v20, 1  ;;  %v2056_v7 = vrot.slane %v2055_v6, 1  ;;  %v2087_v0 = vrot.slane %v2086_v26, 4  ;;  %v2080_v13 = vrot.slane %v2079_v50, 4 }
 0x1c7   : > { %v4843_v9 = vadd.f32 %v2049_v2, %v2048_v24  ;;  %v2070_v39 = vrot.slane %v2069_v22, 1  ;;  %v2074_v27 = vadd.f32 %v2073_v35, %v2072_v36  ;;  %v2094_v59 = vrot.slane %v2093_v10, 4 }
 0x1c8   : > { %v4845_v12 = vadd.f32 %v2063_v61, %v2062_v20  ;;  %v2057_v15 = vadd.f32 %v2056_v7, %v2055_v6  ;;  %v2088_v8 = vadd.f32 %v2087_v0, %v2086_v26  ;;  %v2081_v18 = vadd.f32 %v2080_v13, %v2079_v50 }
 0x1c9   : > { %v4847_v52 = vadd.f32 %v2070_v39, %v2069_v22  ;;  %v2075_v21 = vrot.slane %v2074_v27, 2  ;;  %v2095_v3 = vadd.f32 %v2094_v59, %v2093_v10  ;;  %v1672_v60 = vmul.f32 %v4775_v16, %v4441_v29  ;;  %v2135_v10 = vld [vmem:[%s5209_s4 + $0x8] sm:$0xff] }
 0x1ca   : > { %v2089_v56 = vrot.slane %v2088_v8, 2  ;;  %v2082_v30 = vrot.slane %v2081_v18, 2  ;;  %v1674_v4 = vmul.f32 %v4781_v54, %v4451_v41  ;;  %v1673_v34 = vmul.f32 %v4779_v42, %v4445_v33 }
 0x1cb   : > { %v2076_v40 = vadd.f32 %v2075_v21, %v2074_v27  ;;  %v2096_v14 = vrot.slane %v2095_v3, 2  ;;  %v1675_v58 = vmul.f32 %v4783_v51, %v4456_v45  ;;  %v1676_v17 = vmul.f32 %v4785_v44, %v4453_v19 }
 0x1cc   : > { %v2090_v43 = vadd.f32 %v2089_v56, %v2088_v8  ;;  %v2083_v47 = vadd.f32 %v2082_v30, %v2081_v18  ;;  %v1678_v29 = vmul.f32 %v4794_v63, %v4462_v53  ;;  %v1677_v16 = vmul.f32 %v4787_v5, %v4459_v48  ;;  %v2134_v53 = vld [vmem:[%s5209_s4] sm:$0xff]  ;;  %v5246_v8 = vld [vmem:[#allocation23_spill] sm:$0xff]  ;;  %v2719_v56 = vld [vmem:[%s5210_s5 + $0x10] sm:$0xff] }
 0x1cd   : > { %v2077_v41 = vrot.slane %v2076_v40, 1  ;;  %v2097_v54 = vadd.f32 %v2096_v14, %v2095_v3  ;;  %v2100_v31 = vadd.f32 %v1676_v17, %v1672_v60  ;;  %v1679_v33 = vmul.f32 %v4801_v62, %v4466_v57  ;;  %3560 = vmatmul.mubr.msk.f32.vlgmr.msra.gmra.mrb[64].mxu0 %vm2140_vm2, %v2134_v53  ;;  %3566 = vmatmul.mubr.msk.f32.vlgmr.msra.gmra.mrb[64].mxu1 %vm2140_vm2, %v2134_v53  ;;  %v5254_v53 = vld [vmem:[#allocation17_spill] sm:$0xff] }
 0x1ce   : > { %v2091_v42 = vrot.slane %v2090_v43, 1  ;;  %v2084_v24 = vrot.slane %v2083_v47, 1  ;;  %v2114_v45 = vadd.f32 %v1678_v29, %v1674_v4  ;;  %v2107_v51 = vadd.f32 %v1677_v16, %v1673_v34  ;;  %v2136_v34 = vld [vmem:[%s5209_s4 + $0x10] sm:$0xff] }
 0x1cf   : > { %v4865_v32 = vadd.f32 %v2077_v41, %v2076_v40  ;;  %v2098_v19 = vrot.slane %v2097_v54, 1  ;;  %v2101_v44 = vrot.slane %v2100_v31, 4  ;;  %v2121_v36 = vadd.f32 %v1679_v33, %v1675_v58  ;;  %v5249_v40 = vld [vmem:[#allocation16_spill] sm:$0xff] }
 0x1d0   : > { %v4870_v48 = vadd.f32 %v2091_v42, %v2090_v43  ;;  %v2085_v63 = vadd.f32 %v2084_v24, %v2083_v47  ;;  %v2115_v5 = vrot.slane %v2114_v45, 4  ;;  %v2108_v23 = vrot.slane %v2107_v51, 4  ;;  %v5250_v47 = vld [vmem:[#allocation20_spill] sm:$0xff] }
 0x1d1   : > { %v2099_v20 = vadd.f32 %v2098_v19, %v2097_v54  ;;  %v2102_v57 = vadd.f32 %v2101_v44, %v2100_v31  ;;  %v2122_v62 = vrot.slane %v2121_v36, 4  ;;  %v2442_v50 = vsel %vm2431_vm15, %v4535_v28, %v4518_v37  ;;  %v5245_v37 = vld [vmem:[#allocation19_spill] sm:$0xff]  ;;  %v5251_v33 = vld [vmem:[#allocation24_spill] sm:$0xff] }
 0x1d2   : > { %v2116_v6 = vadd.f32 %v2115_v5, %v2114_v45  ;;  %v2109_v26 = vadd.f32 %v2108_v23, %v2107_v51  ;;  %v5244_v35 = vmov 0.0   ;;  %v2443_v61 = vsel %vm2433_vm0, %v4569_v25, %v2442_v50  ;;  %v5252_v45 = vld [vmem:[#allocation11_spill] sm:$0xff] }
 0x1d3   : > { %v2103_v2 = vrot.slane %v2102_v57, 2  ;;  %v2123_v22 = vadd.f32 %v2122_v62, %v2121_v36  ;;  %2229 = vmatprep.mubr.f32.mxu0 %v5244_v35  ;;  %2330 = vmatprep.mubr.f32.mxu1 %v5244_v35  ;;  %v2470_v7 = vsel %vm2431_vm15, %v4817_v46, %v4792_v1  ;;  %v2444_v28 = vsel %vm2435_vm1, %v5245_v37, %v2443_v61  ;;  %v5247_v1 = vld [vmem:[#allocation10_spill] sm:$0xff]  ;;  %v5248_v46 = vld [vmem:[#allocation12_spill] sm:$0xff]  ;;  %v2718_v19 = vld [vmem:[%s5210_s5 + $0x8] sm:$0xff] }
 0x1d4   : > { %v2117_v0 = vrot.slane %v2116_v6, 2  ;;  %v2110_v13 = vrot.slane %v2109_v26, 2  ;;  %v2471_v39 = vsel %vm2433_vm0, %v2057_v15, %v2470_v7  ;;  %v2445_v18 = vsel %vm2437_vm3, %v5246_v8, %v2444_v28  ;;  %3561 = vmatmul.mubr.msk.f32.gmra.mrb[66].mxu0 %vm2140_vm2, %v2135_v10  ;;  %3567 = vmatmul.mubr.msk.f32.gmra.mrb[66].mxu1 %vm2140_vm2, %v2135_v10  ;;  %v2717_v15 = vld [vmem:[%s5210_s5] sm:$0xff]  ;;  %v2137_v36 = vld [vmem:[%s5209_s4 + $0x18] sm:$0xff] }
 0x1d5   : > { %v2104_v27 = vadd.f32 %v2103_v2, %v2102_v57  ;;  %v2124_v59 = vrot.slane %v2123_v22, 2  ;;  %v2472_v21 = vsel %vm2435_vm1, %v2085_v63, %v2471_v39  ;;  %v2456_v60 = vsel %vm2431_vm15, %v5248_v46, %v5247_v1  ;;  %2235 = vmatprep.mubr.f32.mxu0 %v5244_v35  ;;  %2336 = vmatprep.mubr.f32.mxu1 %v5244_v35  ;;  %v5258_v61 = vld [vmem:[#allocation18_spill] sm:$0xff]  ;;  %v2129_v1 = vld [vmem:[%s5208_s3 + $0x8] sm:$0xff] }
 0x1d6   : > { %v2118_v3 = vadd.f32 %v2117_v0, %v2116_v6  ;;  %v2111_v25 = vadd.f32 %v2110_v13, %v2109_v26  ;;  %v2457_v14 = vsel %vm2433_vm0, %v5249_v40, %v2456_v60  ;;  %v2484_v58 = vsel %vm2431_vm15, %v4822_v11, %v4797_v38  ;;  %v5256_v6 = vld [vmem:[#allocation13_spill] sm:$0xff]  ;;  %v5257_v26 = vld [vmem:[#allocation15_spill] sm:$0xff]  ;;  %v2721_v13 = vld [vmem:[%s5210_s5 + $0x20] sm:$0xff] }
 0x1d7   : > { %v2105_v30 = vrot.slane %v2104_v27, 1  ;;  %v2125_v4 = vadd.f32 %v2124_v59, %v2123_v22  ;;  %v2458_v29 = vsel %vm2435_vm1, %v5250_v47, %v2457_v14  ;;  %v2485_v16 = vsel %vm2433_vm0, %v4847_v52, %v2484_v58  ;;  %v5253_v52 = vld [vmem:[#allocation14_spill] sm:$0xff]  ;;  %v2720_v59 = vld [vmem:[%s5210_s5 + $0x18] sm:$0xff]  ;;  %v2991_v46 = vld [vmem:[%s5214_s9 + $0x8] sm:$0xff] }
 0x1d8   : > { %v2119_v17 = vrot.slane %v2118_v3, 1  ;;  %v2112_v43 = vrot.slane %v2111_v25, 1  ;;  %v3907_v41 = vmov 0   ;;  %v2459_v42 = vsel %vm2437_vm3, %v5251_v33, %v2458_v29  ;;  %3562 = vmatmul.mubr.msk.f32.gmra.mrb[68].mxu0 %vm2140_vm2, %v2136_v34  ;;  %3568 = vmatmul.mubr.msk.f32.gmra.mrb[68].mxu1 %vm2140_vm2, %v2136_v34  ;;  %v2138_v37 = vld [vmem:[%s5209_s4 + $0x20] sm:$0xff]  ;;  %v2133_v40 = vld [vmem:[%s5208_s3 + $0x28] sm:$0xff] }
 0x1d9   : > { %3784 = vset.pattern.permute.xlu0 %v3907_v41  ;;  %3785 = vset.pattern.permute.xlu1 %v3907_v41  ;;  %v2106_v54 = vadd.f32 %v2105_v30, %v2104_v27  ;;  %v2126_v31 = vrot.slane %v2125_v4, 1  ;;  %v2486_v24 = vsel %vm2435_vm1, %v2099_v20, %v2485_v16  ;;  %v2434_v51 = vsel %vm2433_vm0, %v5253_v52, %v5252_v45  ;;  %v5255_v20 = vld [vmem:[#allocation21_spill] sm:$0xff]  ;;  %v2994_v60 = vld [vmem:[%s5214_s9 + $0x20] sm:$0xff] }
 0x1da   : > { %2725 = vperm.xlu0 %3784, %v2717_v15   ;;  %2735 = vperm.xlu1 %3785, %v2719_v56   ;;  %v2120_v38 = vadd.f32 %v2119_v17, %v2118_v3  ;;  %v2113_v11 = vadd.f32 %v2112_v43, %v2111_v25  ;;  %v2436_v63 = vsel %vm2435_vm1, %v5254_v53, %v2434_v51  ;;  %v2804_v3 = vld [vmem:[%s5212_s7 + $0x8] sm:$0xf]  ;;  %v2992_v25 = vld [vmem:[%s5214_s9 + $0x10] sm:$0xff]  ;;  %v2993_v56 = vld [vmem:[%s5214_s9 + $0x18] sm:$0xff] }
 0x1db   : > { %v2127_v44 = vadd.f32 %v2126_v31, %v2125_v4  ;;  %2241 = vmatprep.mubr.f32.mxu0 %v5244_v35  ;;  %2342 = vmatprep.mubr.f32.mxu1 %v5244_v35  ;;  %v2464_v5 = vsel %vm2433_vm0, %v4843_v9, %v4820_v55  ;;  %v2438_v57 = vsel %vm2437_vm3, %v5255_v20, %v2436_v63  ;;  %v2130_v15 = vld [vmem:[%s5208_s3 + $0x10] sm:$0xff]  ;;  %v2131_v30 = vld [vmem:[%s5208_s3 + $0x18] sm:$0xff]  ;;  %v2995_v4 = vld [vmem:[%s5214_s9 + $0x28] sm:$0xff] }
 0x1dc   : > { %v2473_v23 = vsel %vm2437_vm3, %v2113_v11, %v2472_v21  ;;  %v2465_v62 = vsel %vm2435_vm1, %v4865_v32, %v2464_v5  ;;  %v2450_v50 = vsel %vm2433_vm0, %v5257_v26, %v5256_v6  ;;  %3563 = vmatmul.mubr.msk.f32.gmra.mrb[70].mxu0 %vm2140_vm2, %v2137_v36  ;;  %3569 = vmatmul.mubr.msk.f32.gmra.mrb[70].mxu1 %vm2140_vm2, %v2137_v36  ;;  %v5259_v32 = vld [vmem:[#allocation22_spill] sm:$0xff] }
 0x1dd   : > { %v3635_v2 = vpack.c.bf16 %v2473_v23, %v2445_v18  ;;  %v2487_v22 = vsel %vm2437_vm3, %v2127_v44, %v2486_v24  ;;  %v2466_v10 = vsel %vm2437_vm3, %v2106_v54, %v2465_v62  ;;  %v2451_v55 = vsel %vm2435_vm1, %v5258_v61, %v2450_v50  ;;  %2247 = vmatprep.mubr.f32.mxu0 %v5244_v35  ;;  %v2990_v18 = vld [vmem:[%s5214_s9] sm:$0xff] }
 0x1de   : > { %2730 = vperm.xlu0 %3784, %v2718_v19   ;;  %v3639_v9 = vpack.c.bf16 %v2487_v22, %v2459_v42  ;;  %v3637_v7 = vpack.c.bf16 %v2466_v10, %v2438_v57  ;;  %v2452_v0 = vsel %vm2437_vm3, %v5259_v32, %v2451_v55  ;;  %2348 = vmatprep.mubr.f32.mxu1 %v5244_v35  ;;  %v2128_v21 = vld [vmem:[%s5208_s3] sm:$0xff] }
 0x1df   : > { %v2478_v28 = vsel %vm2433_vm0, %v4845_v12, %v4825_v49  ;;  %3636 = vmatprep.subr.bf16.mxu0 %v3635_v2  ;;  %v2803_v49 = vld [vmem:[%s5212_s7] sm:$0xff]  ;;  %v2139_v12 = vld [vmem:[%s5209_s4 + $0x28] sm:$0xff]  ;;  %2740 = vperm.xlu1 %3785, %v2720_v59  }
 0x1e0   : > { %3640 = vmatprep.subr.bf16.mxu1 %v3639_v9  ;;  %v2479_v39 = vsel %vm2435_vm1, %v4870_v48, %v2478_v28  ;;  %3638 = vmatpush1.bf16.msra.mxu0 %v3637_v7  ;;  %v2722_v48 = vld [vmem:[%s5210_s5 + $0x28] sm:$0xff]  ;;  %v2132_v34 = vld [vmem:[%s5208_s3 + $0x20] sm:$0xff] }
 0x1e1   : > { %v2480_v27 = vsel %vm2437_vm3, %v2120_v38, %v2479_v39  ;;  %3564 = vmatmul.mubr.msk.f32.gmra.mrb[72].mxu0 %vm2140_vm2, %v2138_v37  ;;  %3570 = vmatmul.mubr.msk.f32.gmra.mrb[72].mxu1 %vm2140_vm2, %v2138_v37 }
 0x1e2   : > { %2745 = vperm.xlu0 %3784, %v2721_v13   ;;  %v3641_v8 = vpack.c.bf16 %v2480_v27, %v2452_v0  ;;  %2253 = vmatprep.mubr.f32.mxu0 %v5244_v35 }
 0x1e3   : > { %2354 = vmatprep.mubr.f32.mxu1 %v5244_v35  ;;  %2750 = vperm.xlu1 %3785, %v2722_v48  }
 0x1e4   : > { %3642 = vmatpush1.bf16.msra.mxu1 %v3641_v8 }
 0x1e5   : > { %3565 = vmatmul.mubr.msk.f32.gmra.mrb[74].mxu0 %vm2140_vm2, %v2139_v12  ;;  %3571 = vmatmul.mubr.msk.f32.gmra.mrb[74].mxu1 %vm2140_vm2, %v2139_v12 }
 0x1e6   : > { %2807 = vperm.xlu0 %3784, %v2803_v49   ;;  %2579 = vmatprep.mubr.f32.mxu0 %v5244_v35 }
 0x1e7   : > { %2680 = vmatprep.mubr.f32.mxu1 %v5244_v35  ;;  %2812 = vperm.xlu1 %3785, %v2804_v3  }
 0x1e9   : > { %3572 = vmatmul.mubr.msk.f32.vlgmr.msra.gmra.mrb[64].mxu0 %vm2496_vm4, %v2128_v21  ;;  %3578 = vmatmul.mubr.msk.f32.vlgmr.msra.gmra.mrb[64].mxu1 %vm2496_vm4, %v2128_v21 }
 0x1ea   : > { %2998 = vperm.xlu0 %3784, %v2990_v18   ;;  %2585 = vmatprep.mubr.f32.mxu0 %v5244_v35 }
 0x1eb   : > { %2686 = vmatprep.mubr.f32.mxu1 %v5244_v35  ;;  %3003 = vperm.xlu1 %3785, %v2991_v46  }
 0x1ed   : > { %3573 = vmatmul.mubr.msk.f32.gmra.mrb[66].mxu0 %vm2496_vm4, %v2129_v1  ;;  %3579 = vmatmul.mubr.msk.f32.gmra.mrb[66].mxu1 %vm2496_vm4, %v2129_v1 }
 0x1ee   : > { %3008 = vperm.xlu0 %3784, %v2992_v25   ;;  %2591 = vmatprep.mubr.f32.mxu0 %v5244_v35 }
 0x1ef   : > { %2692 = vmatprep.mubr.f32.mxu1 %v5244_v35  ;;  %3013 = vperm.xlu1 %3785, %v2993_v56  }
 0x1f1   : > { %3574 = vmatmul.mubr.msk.f32.gmra.mrb[68].mxu0 %vm2496_vm4, %v2130_v15  ;;  %3580 = vmatmul.mubr.msk.f32.gmra.mrb[68].mxu1 %vm2496_vm4, %v2130_v15 }
 0x1f2   : > { %3018 = vperm.xlu0 %3784, %v2994_v60   ;;  %2597 = vmatprep.mubr.f32.mxu0 %v5244_v35 }
 0x1f3   : > { %2698 = vmatprep.mubr.f32.mxu1 %v5244_v35  ;;  %3023 = vperm.xlu1 %3785, %v2995_v4  }
 0x1f5   : > { %3575 = vmatmul.mubr.msk.f32.gmra.mrb[70].mxu0 %vm2496_vm4, %v2131_v30  ;;  %3581 = vmatmul.mubr.msk.f32.gmra.mrb[70].mxu1 %vm2496_vm4, %v2131_v30 }
 0x1f6   : > { %2603 = vmatprep.mubr.f32.mxu0 %v5244_v35  ;;  %2704 = vmatprep.mubr.f32.mxu1 %v5244_v35 }
 0x1f9   : > { %3576 = vmatmul.mubr.msk.f32.gmra.mrb[72].mxu0 %vm2496_vm4, %v2132_v34  ;;  %3582 = vmatmul.mubr.msk.f32.gmra.mrb[72].mxu1 %vm2496_vm4, %v2132_v34 }
 0x1fa   : > { %2609 = vmatprep.mubr.f32.mxu0 %v5244_v35  ;;  %2710 = vmatprep.mubr.f32.mxu1 %v5244_v35 }
 0x1fd   : > { %3577 = vmatmul.mubr.msk.f32.gmra.mrb[74].mxu0 %vm2496_vm4, %v2133_v40  ;;  %3583 = vmatmul.mubr.msk.f32.gmra.mrb[74].mxu1 %vm2496_vm4, %v2133_v40 }
 0x1fe   : > { %2886 = vmatprep.mubr.f32.mxu0 %v5244_v35  ;;  %2963 = vmatprep.mubr.f32.mxu1 %v5244_v35 }
 0x259   : > { %v2726_v14 = vpop.permute.xlu0 %2725  ;;  %v2736_v54 = vpop.permute.xlu1 %2735 }
 0x25d   : > { %v2731_v29 = vpop.permute.xlu0 %2730 }
 0x25e   : > { %v2741_v55 = vpop.permute.xlu1 %2740 }
 0x261   : > { %v2746_v40 = vpop.permute.xlu0 %2745 }
 0x2bc   : > { %v2581_v58 = vpop.f32.mrb[64].mxu0  ;;  %v2682_v17 = vpop.f32.mrb[64].mxu1 }
 0x2bd   : > { %v2583_v43 = vpop.f32.mrb[65].mxu0  ;;  %v2684_v47 = vpop.f32.mrb[65].mxu1  ;;  %v2753_v16 = vadd.f32 %v2726_v14, %v2581_v58  ;;  %v2755_v41 = vadd.f32 %v2726_v14, %v2682_v17 }
 0x2be   : > { %v2754_v31 = vadd.f32 %v2726_v14, %v2583_v43  ;;  %v2756_v33 = vadd.f32 %v2726_v14, %v2684_v47  ;;  %v2751_v17 = vpop.permute.xlu1 %2750 }
 0x2bf   : > { %v2777_v44 = vmax.f32 %v2753_v16, 0.0  ;;  %v2779_v36 = vmax.f32 %v2755_v41, 0.0 }
 0x2c0   : > { %v2587_v42 = vpop.f32.mrb[66].mxu0  ;;  %v2688_v24 = vpop.f32.mrb[66].mxu1  ;;  %v2778_v5 = vmax.f32 %v2754_v31, 0.0  ;;  %v2780_v23 = vmax.f32 %v2756_v33, 0.0 }
 0x2c1   : > { %v2757_v38 = vadd.f32 %v2731_v29, %v2587_v42  ;;  %v2759_v11 = vadd.f32 %v2731_v29, %v2688_v24  ;;  %v2589_v45 = vpop.f32.mrb[67].mxu0  ;;  %v2690_v52 = vpop.f32.mrb[67].mxu1 }
 0x2c2   : > { %v2758_v51 = vadd.f32 %v2731_v29, %v2589_v45  ;;  %v2760_v19 = vadd.f32 %v2731_v29, %v2690_v52 }
 0x2c3   : > { %v2781_v53 = vmax.f32 %v2757_v38, 0.0  ;;  %v2783_v63 = vmax.f32 %v2759_v11, 0.0 }
 0x2c4   : > { %v2782_v20 = vmax.f32 %v2758_v51, 0.0  ;;  %v2784_v57 = vmax.f32 %v2760_v19, 0.0  ;;  %v2593_v62 = vpop.f32.mrb[68].mxu0  ;;  %v2694_v6 = vpop.f32.mrb[68].mxu1 }
 0x2c5   : > { %v3645_v26 = vpack.c.bf16 %v2781_v53, %v2777_v44  ;;  %v3657_v50 = vpack.c.bf16 %v2783_v63, %v2779_v36  ;;  %v2595_v2 = vpop.f32.mrb[69].mxu0  ;;  %v2696_v22 = vpop.f32.mrb[69].mxu1  ;;  %v2761_v9 = vadd.f32 %v2736_v54, %v2593_v62  ;;  %v2763_v7 = vadd.f32 %v2736_v54, %v2694_v6  ;;  %v2801_v62 = vld [vmem:[%s5211_s6] sm:$0xff]  ;;  %v2802_v6 = vld [vmem:[%s5211_s6 + $0x8] sm:$0xf] }
 0x2c6   : > { %v3643_v10 = vpack.c.bf16 %v2782_v20, %v2778_v5  ;;  %v3655_v61 = vpack.c.bf16 %v2784_v57, %v2780_v23  ;;  %v2762_v32 = vadd.f32 %v2736_v54, %v2595_v2  ;;  %v2764_v0 = vadd.f32 %v2736_v54, %v2696_v22 }
 0x2c7   : > { %v2785_v12 = vmax.f32 %v2761_v9, 0.0  ;;  %v2787_v48 = vmax.f32 %v2763_v7, 0.0 }
 0x2c8   : > { %v2599_v13 = vpop.f32.mrb[70].mxu0  ;;  %v2700_v37 = vpop.f32.mrb[70].mxu1  ;;  %3644 = vmatprep.subr.bf16.mxu0 %v3643_v10  ;;  %3656 = vmatprep.subr.bf16.mxu1 %v3655_v61  ;;  %v2786_v3 = vmax.f32 %v2762_v32, 0.0  ;;  %v2788_v25 = vmax.f32 %v2764_v0, 0.0 }
 0x2c9   : > { %v2765_v28 = vadd.f32 %v2741_v55, %v2599_v13  ;;  %v2767_v39 = vadd.f32 %v2741_v55, %v2700_v37  ;;  %v2601_v27 = vpop.f32.mrb[71].mxu0  ;;  %v2702_v59 = vpop.f32.mrb[71].mxu1  ;;  %3646 = vmatpush1.bf16.msra.mxu0 %v3645_v26  ;;  %3658 = vmatpush1.bf16.msra.mxu1 %v3657_v50 }
 0x2ca   : > { %v2766_v8 = vadd.f32 %v2741_v55, %v2601_v27  ;;  %v2768_v49 = vadd.f32 %v2741_v55, %v2702_v59  ;;  %v2808_v10 = vpop.permute.xlu0 %2807  ;;  %v2813_v61 = vpop.permute.xlu1 %2812 }
 0x2cb   : > { %v2789_v18 = vmax.f32 %v2765_v28, 0.0  ;;  %v2791_v21 = vmax.f32 %v2767_v39, 0.0 }
 0x2cc   : > { %v2790_v1 = vmax.f32 %v2766_v8, 0.0  ;;  %v2792_v46 = vmax.f32 %v2768_v49, 0.0  ;;  %v2605_v60 = vpop.f32.mrb[72].mxu0  ;;  %v2706_v15 = vpop.f32.mrb[72].mxu1 }
 0x2cd   : > { %v3649_v56 = vpack.c.bf16 %v2789_v18, %v2785_v12  ;;  %v3661_v30 = vpack.c.bf16 %v2791_v21, %v2787_v48  ;;  %v2607_v4 = vpop.f32.mrb[73].mxu0  ;;  %v2708_v34 = vpop.f32.mrb[73].mxu1  ;;  %v2769_v43 = vadd.f32 %v2746_v40, %v2605_v60  ;;  %v2771_v47 = vadd.f32 %v2746_v40, %v2706_v15 }
 0x2ce   : > { %v3647_v14 = vpack.c.bf16 %v2790_v1, %v2786_v3  ;;  %v3659_v58 = vpack.c.bf16 %v2792_v46, %v2788_v25  ;;  %v2770_v29 = vadd.f32 %v2746_v40, %v2607_v4  ;;  %v2772_v16 = vadd.f32 %v2746_v40, %v2708_v34  ;;  %v2985_v4 = vld [vmem:[%s5213_s8 + $0x8] sm:$0xff]  ;;  %v2986_v34 = vld [vmem:[%s5213_s8 + $0x10] sm:$0xff]  ;;  %v2987_v40 = vld [vmem:[%s5213_s8 + $0x18] sm:$0xff] }
 0x2cf   : > { %v2793_v45 = vmax.f32 %v2769_v43, 0.0  ;;  %v2795_v52 = vmax.f32 %v2771_v47, 0.0 }
 0x2d0   : > { %v2611_v41 = vpop.f32.mrb[74].mxu0  ;;  %v2712_v54 = vpop.f32.mrb[74].mxu1  ;;  %3648 = vmatprep.subr.bf16.mxu0 %v3647_v14  ;;  %3660 = vmatprep.subr.bf16.mxu1 %v3659_v58  ;;  %v2794_v44 = vmax.f32 %v2770_v29, 0.0  ;;  %v2796_v36 = vmax.f32 %v2772_v16, 0.0  ;;  %v2988_v14 = vld [vmem:[%s5213_s8 + $0x20] sm:$0xff]  ;;  %v2989_v58 = vld [vmem:[%s5213_s8 + $0x28] sm:$0xff] }
 0x2d1   : > { %v2773_v31 = vadd.f32 %v2751_v17, %v2611_v41  ;;  %v2775_v33 = vadd.f32 %v2751_v17, %v2712_v54  ;;  %v2613_v42 = vpop.f32.mrb[75].mxu0  ;;  %v2714_v24 = vpop.f32.mrb[75].mxu1  ;;  %3650 = vmatpush1.bf16.msra.mxu0 %v3649_v56  ;;  %3662 = vmatpush1.bf16.msra.mxu1 %v3661_v30  ;;  %v2984_v30 = vld [vmem:[%s5213_s8] sm:$0xff] }
 0x2d2   : > { %v2774_v38 = vadd.f32 %v2751_v17, %v2613_v42  ;;  %v2776_v11 = vadd.f32 %v2751_v17, %v2714_v24  ;;  %v2999_v17 = vpop.permute.xlu0 %2998  ;;  %v3004_v41 = vpop.permute.xlu1 %3003 }
 0x2d3   : > { %v2797_v51 = vmax.f32 %v2773_v31, 0.0  ;;  %v2799_v19 = vmax.f32 %v2775_v33, 0.0 }
 0x2d4   : > { %v2798_v53 = vmax.f32 %v2774_v38, 0.0  ;;  %v2800_v63 = vmax.f32 %v2776_v11, 0.0 }
 0x2d5   : > { %v3653_v5 = vpack.c.bf16 %v2797_v51, %v2793_v45  ;;  %v3665_v23 = vpack.c.bf16 %v2799_v19, %v2795_v52 }
 0x2d6   : > { %v3651_v20 = vpack.c.bf16 %v2798_v53, %v2794_v44  ;;  %v3663_v57 = vpack.c.bf16 %v2800_v63, %v2796_v36  ;;  %v3009_v44 = vpop.permute.xlu0 %3008 }
 0x2d8   : > { %3652 = vmatprep.subr.bf16.mxu0 %v3651_v20  ;;  %3664 = vmatprep.subr.bf16.mxu1 %v3663_v57 }
 0x2d9   : > { %3654 = vmatpush1.bf16.msra.mxu0 %v3653_v5  ;;  %3666 = vmatpush1.bf16.msra.mxu1 %v3665_v23 }
 0x2dc   : > { %3584 = vmatmul.mubr.msk.f32.vlgmr.msra.gmra.mrb[76].mxu0 %vm2815_vm5, %v2801_v62  ;;  %3586 = vmatmul.mubr.msk.f32.vlgmr.msra.gmra.mrb[76].mxu1 %vm2815_vm5, %v2801_v62 }
 0x2dd   : > { %2892 = vmatprep.mubr.f32.mxu0 %v5244_v35  ;;  %2969 = vmatprep.mubr.f32.mxu1 %v5244_v35 }
 0x2e0   : > { %3585 = vmatmul.mubr.msk.f32.gmra.mrb[78].mxu0 %vm2815_vm5, %v2802_v6  ;;  %3587 = vmatmul.mubr.msk.f32.gmra.mrb[78].mxu1 %vm2815_vm5, %v2802_v6 }
 0x2e1   : > { %3121 = vmatprep.mubr.f32.mxu0 %v5244_v35  ;;  %3222 = vmatprep.mubr.f32.mxu1 %v5244_v35 }
 0x3af   : > { %v2888_v26 = vpop.f32.mrb[76].mxu0  ;;  %v2965_v50 = vpop.f32.mrb[76].mxu1 }
 0x3b0   : > { %v2890_v2 = vpop.f32.mrb[77].mxu0  ;;  %v2967_v22 = vpop.f32.mrb[77].mxu1  ;;  %v2889_v55 = vadd.f32 %v2888_v26, %v2808_v10  ;;  %v2966_v9 = vadd.f32 %v2965_v50, %v2808_v10 }
 0x3b1   : > { %v2891_v7 = vadd.f32 %v2890_v2, %v2808_v10  ;;  %v2968_v32 = vadd.f32 %v2967_v22, %v2808_v10  ;;  %v3014_v22 = vpop.permute.xlu1 %3013 }
 0x3b2   : > { %v2976_v49 = vmax.f32 %v2889_v55, 0.0  ;;  %v2978_v12 = vmax.f32 %v2966_v9, 0.0 }
 0x3b3   : > { %v2894_v0 = vpop.f32.mrb[78].mxu0  ;;  %v2971_v13 = vpop.f32.mrb[78].mxu1  ;;  %v2977_v21 = vmax.f32 %v2891_v7, 0.0  ;;  %v2979_v3 = vmax.f32 %v2968_v32, 0.0 }
 0x3b4   : > { %v2895_v37 = vadd.f32 %v2894_v0, %v2813_v61  ;;  %v2972_v28 = vadd.f32 %v2971_v13, %v2813_v61  ;;  %v2896_v39 = vpop.f32.mrb[79].mxu0  ;;  %v2973_v27 = vpop.f32.mrb[79].mxu1 }
 0x3b5   : > { %v2897_v59 = vadd.f32 %v2896_v39, %v2813_v61  ;;  %v2974_v8 = vadd.f32 %v2973_v27, %v2813_v61 }
 0x3b6   : > { %v2980_v48 = vmax.f32 %v2895_v37, 0.0  ;;  %v2982_v18 = vmax.f32 %v2972_v28, 0.0 }
 0x3b7   : > { %v2981_v25 = vmax.f32 %v2897_v59, 0.0  ;;  %v2983_v1 = vmax.f32 %v2974_v8, 0.0  ;;  %v3019_v59 = vpop.permute.xlu0 %3018 }
 0x3b8   : > { %v3670_v46 = vpack.c.bf16 %v2980_v48, %v2976_v49  ;;  %v3676_v60 = vpack.c.bf16 %v2982_v18, %v2978_v12 }
 0x3b9   : > { %v3667_v15 = vpack.c.bf16 %v2981_v25, %v2977_v21  ;;  %v3673_v56 = vpack.c.bf16 %v2983_v1, %v2979_v3 }
 0x3bb   : > { %3669 = vmatprep.subr.msk.bf16.mxu0 %vm3668_vm7, %v3667_v15  ;;  %3675 = vmatprep.subr.msk.bf16.mxu1 %vm3668_vm7, %v3673_v56  ;;  %v3024_v56 = vpop.permute.xlu1 %3023 }
 0x3bc   : > { %3672 = vmatpush1.bf16.msk.msra.mxu0 %vm3668_vm7, %v3670_v46  ;;  %3678 = vmatpush1.bf16.msk.msra.mxu1 %vm3668_vm7, %v3676_v60 }
 0x3bf   : > { %3590 = vmatmul.mubr.msk.f32.vlgmr.msra.gmra.mrb[80].mxu0 %vm3026_vm8, %v2984_v30  ;;  %3598 = vmatmul.mubr.msk.f32.vlgmr.msra.gmra.mrb[80].mxu1 %vm3026_vm8, %v2984_v30 }
 0x3c0   : > { %3127 = vmatprep.mubr.f32.mxu0 %v5244_v35  ;;  %3228 = vmatprep.mubr.f32.mxu1 %v5244_v35 }
 0x3c3   : > { %3591 = vmatmul.mubr.msk.f32.gmra.mrb[82].mxu0 %vm3026_vm8, %v2985_v4  ;;  %3599 = vmatmul.mubr.msk.f32.gmra.mrb[82].mxu1 %vm3026_vm8, %v2985_v4 }
 0x3c4   : > { %3133 = vmatprep.mubr.f32.mxu0 %v5244_v35  ;;  %3234 = vmatprep.mubr.f32.mxu1 %v5244_v35 }
 0x3c7   : > { %3592 = vmatmul.mubr.msk.f32.gmra.mrb[84].mxu0 %vm3026_vm8, %v2986_v34  ;;  %3600 = vmatmul.mubr.msk.f32.gmra.mrb[84].mxu1 %vm3026_vm8, %v2986_v34 }
 0x3c8   : > { %3139 = vmatprep.mubr.f32.mxu0 %v5244_v35  ;;  %3240 = vmatprep.mubr.f32.mxu1 %v5244_v35 }
 0x3cb   : > { %3593 = vmatmul.mubr.msk.f32.gmra.mrb[86].mxu0 %vm3026_vm8, %v2987_v40  ;;  %3601 = vmatmul.mubr.msk.f32.gmra.mrb[86].mxu1 %vm3026_vm8, %v2987_v40 }
 0x3cc   : > { %3145 = vmatprep.mubr.f32.mxu0 %v5244_v35  ;;  %3246 = vmatprep.mubr.f32.mxu1 %v5244_v35 }
 0x3cf   : > { %3594 = vmatmul.mubr.msk.f32.gmra.mrb[88].mxu0 %vm3026_vm8, %v2988_v14  ;;  %3602 = vmatmul.mubr.msk.f32.gmra.mrb[88].mxu1 %vm3026_vm8, %v2988_v14 }
 0x3d0   : > { %3151 = vmatprep.mubr.f32.mxu0 %v5244_v35  ;;  %3252 = vmatprep.mubr.f32.mxu1 %v5244_v35 }
 0x3d3   : > { %3595 = vmatmul.mubr.msk.f32.gmra.mrb[90].mxu0 %vm3026_vm8, %v2989_v58  ;;  %3603 = vmatmul.mubr.msk.f32.gmra.mrb[90].mxu1 %vm3026_vm8, %v2989_v58 }
 0x492   : > { %v3123_v43 = vpop.f32.mrb[80].mxu0  ;;  %v3224_v47 = vpop.f32.mrb[80].mxu1 }
 0x493   : > { %v3125_v29 = vpop.f32.mrb[81].mxu0  ;;  %v3226_v16 = vpop.f32.mrb[81].mxu1  ;;  %v3124_v33 = vadd.f32 %v3123_v43, %v2999_v17  ;;  %v3225_v42 = vadd.f32 %v3224_v47, %v2999_v17 }
 0x494   : > { %v3126_v45 = vadd.f32 %v3125_v29, %v2999_v17  ;;  %v3227_v52 = vadd.f32 %v3226_v16, %v2999_v17 }
 0x496   : > { %v3129_v54 = vpop.f32.mrb[82].mxu0  ;;  %v3230_v31 = vpop.f32.mrb[82].mxu1 }
 0x497   : > { %v3130_v24 = vadd.f32 %v3129_v54, %v3004_v41  ;;  %v3231_v35 = vadd.f32 %v3230_v31, %v3004_v41  ;;  %v3131_v38 = vpop.f32.mrb[83].mxu0  ;;  %v3232_v11 = vpop.f32.mrb[83].mxu1 }
 0x498   : > { %v3132_v51 = vadd.f32 %v3131_v38, %v3004_v41  ;;  %v3233_v19 = vadd.f32 %v3232_v11, %v3004_v41 }
 0x499   : > { %v3259_v36 = vmax.f32 %v3124_v33, %v3130_v24  ;;  %v3281_v53 = vmax.f32 %v3225_v42, %v3231_v35 }
 0x49a   : > { %v3270_v63 = vmax.f32 %v3126_v45, %v3132_v51  ;;  %v3292_v5 = vmax.f32 %v3227_v52, %v3233_v19  ;;  %v3135_v23 = vpop.f32.mrb[84].mxu0  ;;  %v3236_v20 = vpop.f32.mrb[84].mxu1 }
 0x49b   : > { %v3136_v57 = vadd.f32 %v3135_v23, %v3009_v44  ;;  %v3237_v62 = vadd.f32 %v3236_v20, %v3009_v44  ;;  %v3137_v6 = vpop.f32.mrb[85].mxu0  ;;  %v3238_v26 = vpop.f32.mrb[85].mxu1 }
 0x49c   : > { %v3138_v50 = vadd.f32 %v3137_v6, %v3009_v44  ;;  %v3239_v2 = vadd.f32 %v3238_v26, %v3009_v44 }
 0x49d   : > { %v3260_v10 = vmax.f32 %v3259_v36, %v3136_v57  ;;  %v3282_v61 = vmax.f32 %v3281_v53, %v3237_v62 }
 0x49e   : > { %v3271_v55 = vmax.f32 %v3270_v63, %v3138_v50  ;;  %v3293_v9 = vmax.f32 %v3292_v5, %v3239_v2  ;;  %v3141_v7 = vpop.f32.mrb[86].mxu0  ;;  %v3242_v32 = vpop.f32.mrb[86].mxu1 }
 0x49f   : > { %v3142_v0 = vadd.f32 %v3141_v7, %v3014_v22  ;;  %v3243_v13 = vadd.f32 %v3242_v32, %v3014_v22  ;;  %v3143_v37 = vpop.f32.mrb[87].mxu0  ;;  %v3244_v28 = vpop.f32.mrb[87].mxu1 }
 0x4a0   : > { %v3144_v39 = vadd.f32 %v3143_v37, %v3014_v22  ;;  %v3245_v27 = vadd.f32 %v3244_v28, %v3014_v22  ;;  %v3794_v37 = vld [vmem:[%s4369_s11] sm:$0xff] }
 0x4a1   : > { %v3261_v8 = vmax.f32 %v3260_v10, %v3142_v0  ;;  %v3283_v49 = vmax.f32 %v3282_v61, %v3243_v13 }
 0x4a2   : > { %v3272_v12 = vmax.f32 %v3271_v55, %v3144_v39  ;;  %v3294_v48 = vmax.f32 %v3293_v9, %v3245_v27  ;;  %v3147_v18 = vpop.f32.mrb[88].mxu0  ;;  %v3248_v21 = vpop.f32.mrb[88].mxu1  ;;  %v3795_v39 = vld [vmem:[%s4369_s11 + $0x20] sm:$0xff] }
 0x4a3   : > { %v3148_v3 = vadd.f32 %v3147_v18, %v3019_v59  ;;  %v3249_v25 = vadd.f32 %v3248_v21, %v3019_v59  ;;  %v3149_v1 = vpop.f32.mrb[89].mxu0  ;;  %v3250_v46 = vpop.f32.mrb[89].mxu1  ;;  %v3799_v21 = vld [vmem:[%s4369_s11 + $0x30] sm:$0xff] }
 0x4a4   : > { %v3150_v60 = vadd.f32 %v3149_v1, %v3019_v59  ;;  %v3251_v15 = vadd.f32 %v3250_v46, %v3019_v59  ;;  %v3796_v59 = vld [vmem:[%s4369_s11 + $0x40] sm:$0xff]  ;;  %v3801_v46 = vld [vmem:[%s4369_s11 + $0x70] sm:$0xff] }
 0x4a5   : > { %v3262_v30 = vmax.f32 %v3261_v8, %v3148_v3  ;;  %v3284_v4 = vmax.f32 %v3283_v49, %v3249_v25  ;;  %v3797_v49 = vld [vmem:[%s4369_s11 + $0x60] sm:$0xff]  ;;  %v3800_v25 = vld [vmem:[%s4369_s11 + $0x50] sm:$0xff] }
 0x4a6   : > { %v3273_v34 = vmax.f32 %v3272_v12, %v3150_v60  ;;  %v3295_v40 = vmax.f32 %v3294_v48, %v3251_v15  ;;  %v3153_v14 = vpop.f32.mrb[90].mxu0  ;;  %v3254_v58 = vpop.f32.mrb[90].mxu1  ;;  %v3798_v48 = vld [vmem:[%s4369_s11 + $0x10] sm:$0xff] }
 0x4a7   : > { %v3154_v17 = vadd.f32 %v3153_v14, %v3024_v56  ;;  %v3255_v43 = vadd.f32 %v3254_v58, %v3024_v56  ;;  %v3155_v47 = vpop.f32.mrb[91].mxu0  ;;  %v3256_v29 = vpop.f32.mrb[91].mxu1  ;;  %v3804_v14 = vld [vmem:[%s4369_s11 + $0x48] sm:$0xff] }
 0x4a8   : > { %v3156_v16 = vadd.f32 %v3155_v47, %v3024_v56  ;;  %v3257_v41 = vadd.f32 %v3256_v29, %v3024_v56  ;;  %v3806_v47 = vld [vmem:[%s4369_s11 + $0x18] sm:$0xff] }
 0x4a9   : > { %v3263_v54 = vmax.f32 %v3262_v30, %v3154_v17  ;;  %v3285_v31 = vmax.f32 %v3284_v4, %v3255_v43  ;;  %v3802_v30 = vld [vmem:[%s4369_s11 + $0x8] sm:$0xff] }
 0x4aa   : > { %v3274_v33 = vmax.f32 %v3273_v34, %v3156_v16  ;;  %v3296_v42 = vmax.f32 %v3295_v40, %v3257_v41  ;;  %v3803_v34 = vld [vmem:[%s4369_s11 + $0x28] sm:$0xff]  ;;  %v3807_v16 = vld [vmem:[%s4369_s11 + $0x38] sm:$0xff] }
 0x4ab   : > { %v3264_v24 = vrot.slane %v3263_v54, 4  ;;  %v3286_v35 = vrot.slane %v3285_v31, 4  ;;  %v3805_v17 = vld [vmem:[%s4369_s11 + $0x68] sm:$0xff] }
 0x4ac   : > { %v3275_v38 = vrot.slane %v3274_v33, 4  ;;  %v3297_v11 = vrot.slane %v3296_v42, 4 }
 0x4ad   : > { %v3265_v45 = vmax.f32 %v3263_v54, %v3264_v24  ;;  %v3287_v52 = vmax.f32 %v3285_v31, %v3286_v35  ;;  %v3808_v54 = vld [vmem:[%s4369_s11 + $0x58] sm:$0xff] }
 0x4ae   : > { %v3276_v51 = vmax.f32 %v3274_v33, %v3275_v38  ;;  %v3298_v19 = vmax.f32 %v3296_v42, %v3297_v11  ;;  %v3809_v33 = vld [vmem:[%s4369_s11 + $0x78] sm:$0xff]  ;;  %s3814_s11 = sshll.u32 %s3909_s16, 4  ;;  %s3815_s11 = int_to_ptr.vmem [resolvable:$false] %s3814_s11 }
 0x4af   : > { %v3266_v44 = vrot.slane %v3265_v45, 2  ;;  %v3288_v36 = vrot.slane %v3287_v52, 2  ;;  %s3816_s29 = scalar_lea.vmem %s3815_s11, 4096  ;;  %p3817_p6 = scmp.lt.s32.totalorder %s5137_s13, %s3815_s11 }
 0x4b0   : > { %v3277_v53 = vrot.slane %v3276_v51, 2  ;;  %v3299_v63 = vrot.slane %v3298_v19, 2  ;;  %p3818_p7 = scmp.lt.s32.totalorder %s3816_s29, %s3810_s25 }
 0x4b1   : > { %v3267_v5 = vmax.f32 %v3265_v45, %v3266_v44  ;;  %v3289_v23 = vmax.f32 %v3287_v52, %v3288_v36 }
 0x4b2   : > { %v3278_v20 = vmax.f32 %v3276_v51, %v3277_v53  ;;  %v3300_v57 = vmax.f32 %v3298_v19, %v3299_v63  ;;  %p3819_p10 = por %p3818_p7, %p3817_p6 }
 0x4b3   : > { %v3268_v62 = vrot.slane %v3267_v5, 1  ;;  %v3290_v6 = vrot.slane %v3289_v23, 1 }
 0x4b4   : > { %v3279_v26 = vrot.slane %v3278_v20, 1  ;;  %v3301_v50 = vrot.slane %v3300_v57, 1  ;;  %p3820_p11 = pnand %p3819_p10, %p3813_p5 }
 0x4b5   : > { %v3269_v2 = vmax.f32 %v3267_v5, %v3268_v62  ;;  %v3291_v22 = vmax.f32 %v3289_v23, %v3290_v6 }
 0x4b6   : > { %v3280_v10 = vmax.f32 %v3278_v20, %v3279_v26  ;;  %v3302_v61 = vmax.f32 %v3300_v57, %v3301_v50 }
 0x4b7   : > { %3786 = vtanh.f32 %v3269_v2 }
 0x4b8   : > { %3788 = vtanh.f32 %v3291_v22 }
 0x4b9   : > { %3790 = vtanh.f32 %v3280_v10 }
 0x4ba   : > { %3792 = vtanh.f32 %v3302_v61 }
 0x4c1   : > { %v3787_v55 = vpop.eup %3786 }
 0x4c2   : > { %v3789_v9 = vpop.eup %3788  ;;  %v3307_v7 = vadd.f32 1.0, %v3787_v55 }
 0x4c3   : > { %v3791_v32 = vpop.eup %3790  ;;  %v3309_v0 = vadd.f32 1.0, %v3789_v9 }
 0x4c4   : > { %v3793_v13 = vpop.eup %3792  ;;  %v3311_v28 = vmul.f32 %v3794_v37, %v3307_v7  ;;  %v3315_v27 = vmul.f32 %v3795_v39, %v3307_v7  ;;  %v3319_v8 = vmul.f32 %v3796_v59, %v3307_v7  ;;  %v3323_v12 = vmul.f32 %v3797_v49, %v3307_v7 }
 0x4c5   : > { %v3313_v18 = vmul.f32 %v3798_v48, %v3309_v0  ;;  %v3317_v3 = vmul.f32 %v3799_v21, %v3309_v0  ;;  %v3321_v1 = vmul.f32 %v3800_v25, %v3309_v0  ;;  %v3325_v60 = vmul.f32 %v3801_v46, %v3309_v0 }
 0x4c6   : > { %3327 = vst [vmem:[%s5117_s17] sm:$0xff] %v3311_v28  ;;  %3331 = vst [vmem:[%s5117_s17 + $0x20] sm:$0xff] %v3315_v27  ;;  %v3308_v15 = vadd.f32 1.0, %v3791_v32  ;;  %v3310_v56 = vadd.f32 1.0, %v3793_v13 }
 0x4c7   : > { %3335 = vst [vmem:[%s5117_s17 + $0x40] sm:$0xff] %v3319_v8  ;;  %3339 = vst [vmem:[%s5117_s17 + $0x60] sm:$0xff] %v3323_v12 }
 0x4c8   : > { %3329 = vst [vmem:[%s5117_s17 + $0x10] sm:$0xff] %v3313_v18  ;;  %3333 = vst [vmem:[%s5117_s17 + $0x30] sm:$0xff] %v3317_v3  ;;  %v3312_v4 = vmul.f32 %v3802_v30, %v3308_v15  ;;  %v3316_v40 = vmul.f32 %v3803_v34, %v3308_v15  ;;  %v3320_v58 = vmul.f32 %v3804_v14, %v3308_v15 }
 0x4c9   : > { %3337 = vst [vmem:[%s5117_s17 + $0x50] sm:$0xff] %v3321_v1  ;;  %3341 = vst [vmem:[%s5117_s17 + $0x70] sm:$0xff] %v3325_v60  ;;  %v3324_v43 = vmul.f32 %v3805_v17, %v3308_v15  ;;  %v3314_v29 = vmul.f32 %v3806_v47, %v3310_v56  ;;  %v3318_v41 = vmul.f32 %v3807_v16, %v3310_v56 }
 0x4ca   : > { %v3322_v31 = vmul.f32 %v3808_v54, %v3310_v56  ;;  %v3326_v42 = vmul.f32 %v3809_v33, %v3310_v56  ;;  %3328 = vst [vmem:[%s5117_s17 + $0x8] sm:$0xff] %v3312_v4  ;;  %3332 = vst [vmem:[%s5117_s17 + $0x28] sm:$0xff] %v3316_v40 }
 0x4cb   : > { %3336 = vst [vmem:[%s5117_s17 + $0x48] sm:$0xff] %v3320_v58  ;;  %3340 = vst [vmem:[%s5117_s17 + $0x68] sm:$0xff] %v3324_v43 }
 0x4cc   : > { %3330 = vst [vmem:[%s5117_s17 + $0x18] sm:$0xff] %v3314_v29  ;;  %3334 = vst [vmem:[%s5117_s17 + $0x38] sm:$0xff] %v3318_v41 }
 0x4cd   : > { %3338 = vst [vmem:[%s5117_s17 + $0x58] sm:$0xff] %v3322_v31  ;;  %3342 = vst [vmem:[%s5117_s17 + $0x78] sm:$0xff] %v3326_v42 }
 0x4ce   : > { %3823 = shalt.err (!%p3820_p11)
}
 0x4cf   : > { %s3824_s24 = scalar_lea.hbm %s5127_s21, 2048  ;;  %s3828_s17 = scalar_lea.hbm %s5215_s10, 8192 }
 0x4d0   : > { %p3825_p12 = scmp.ne.s32.totalorder %s5127_s21, %s3824_s24  ;;  %p3829_p1 = scmp.lt.u32.totalorder %s5127_s21, %s5215_s10 }
 0x4d1   : > { %p3830_p2 = scmp.lt.u32.totalorder %s3828_s17, %s3824_s24  ;;  %p3832_p4 = scmp.lt.u32.totalorder %s3824_s24, %s5127_s21 }
 0x4d2   : > { %p3826_p13 = pnand %p3825_p12, %p4028_p8 }
 0x4d3   : > { %p3831_p3 = por %p3830_p2, %p3829_p1 }
 0x4d4   : > { %p3827_p0 = pneg %p3826_p13 }
 0x4d5   : > { %p3833_p5 = por %p3832_p4, %p3831_p3 }
 0x4d7   : > { %p3834_p6 = pnand %p3833_p5, %p3827_p0 }
 0x4d9   : > { %3837 = shalt.err (!%p3834_p6)
}
 0x4da   : > { %s3910_s25 = smov 512   ;;  %s3911_s16 = smov 1024  }
 0x4db   : > { %s3912_s11 = smov 32  }
 0x4dc   : > { %3707 = dma.vmem_to_hbm [thread:$0]  (%p4028_p8), %s5137_s13, 2048, %s5127_s21, %s5153_s22, %s3910_s25, %s3911_s16, %s3912_s11  }
 0x4dd PF: > { %s5260_s29 = sld [smem:[#allocation6_spill]]  ;;  %p3713_p7 = scmp.ge.s32.totalorder %s3904_s20, 2 }
 0x4df   : > { %p3710_p10 = pnand %p3713_p7, %p4032_p9 }
 0x4e3   : > { %s3374_s26 = sand.u32 1, %s5260_s29  }
 0x4e4   : > { %s3375_s24 = scalar_lea.sflag [#allocation4], %s3374_s26 }
 0x4e5   : > { %3871 = dma.done.wait (!%p3710_p10), %s3375_s24, 2048  }
 0x4e6   : > { %3873 = vsyncadd (!%p3710_p10), %s3375_s24, 4294965248  ;;  %s23_s20 = sadd.s32 1, %s3904_s20   ;;  %s5262_s27 = sld [smem:[#allocation7_spill]] }
 0x4e7   : > { %p20_p11 = scmp.ge.s32.totalorder %s23_s20, 6   ;;  %s5263_s21 = sld [smem:[#allocation8_spill]] }
 0x4e8   : > { %s5264_s13 = smov %s3880_s14  ;;  %s5265_s14 = smov %s3884_s15 }
 0x4e9   : > { %s5266_s15 = smov %s4040_s12  ;;  %s5267_s16 = smov %s3896_s18 }
 0x4ea   : > { %s5268_s17 = smov %s3900_s19  ;;  %22 = sbr.rel (!%p20_p11) target bundleno = 5 (0x5), region = 129 }
 0x4ec   : > { %s5269_s18 = smov %s5262_s27 }
 0x4ed   : > { %s5270_s19 = smov %s5263_s21 }
 0x4f1   :  { %3380 = vsyncpa [#allocation4], 1 }
 0x4f2   :  { %3382 = vsyncpa [#allocation4 + $0x1], 1 }

</bundles_post_ra>
